<compile_context>
chip_gen: v7x
topology: tpu7x:2x2x1
jax: 0.10.0
libtpu: 0.0.40
codegen_flags: <defaults>
</compile_context>

<pallas_src>
import functools
import math

import jax
import jax.numpy as jnp
from jax import lax
from jax.experimental import pallas as pl
from jax.experimental.pallas import tpu as pltpu


# ---------------------------------------------------------------------------
# Kernel
# ---------------------------------------------------------------------------

def _gcn_layer_kernel(*refs, tk, single_pass, fused_transform,
                      apply_log_softmax, n_valid_out):
    """One GCN aggregation pass with a fused epilogue.

    refs (in order):
      a_ref   : (TM, TK_eff) bf16  -- streamed A row panel
      x_ref   : (Npad, Fx)   bf16  -- VMEM-resident feature operand
      [w1_ref, b1_ref, w2_ref]  (fused_transform)  or  [b_ref]
      o_ref   : (TM, Fout)
      [acc_ref: (TM, Fx) f32 scratch]  (tiled path only)
    """
    it = iter(refs)
    a_ref = next(it)
    x_ref = next(it)
    if fused_transform:
        w1_ref = next(it)
        b1_ref = next(it)
        w2_ref = next(it)
        b_ref = None
    else:
        b_ref = next(it)
        w1_ref = b1_ref = w2_ref = None
    o_ref = next(it)
    acc_ref = next(it, None)

    def partial_sum():
        if single_pass:
            x_panel = x_ref[...]
        else:
            k = pl.program_id(1)
            start = pl.multiple_of(k * tk, tk)
            x_panel = x_ref[pl.ds(start, tk), :]
        # (TM, TK) @ (TK, Fx) on the MXU, bf16 in / f32 accumulate.
        return jnp.dot(a_ref[...], x_panel, preferred_element_type=jnp.float32)

    def epilogue(acc):
        if fused_transform:
            # relu((A@X) @ W1 + b1) @ W2 -- keep the MXU in bf16 (v5e/v6e native).
            h = jnp.dot(acc.astype(jnp.bfloat16), w1_ref[...],
                        preferred_element_type=jnp.float32) + b1_ref[...]
            h = jnp.maximum(h, 0.0)
            out = jnp.dot(h.astype(jnp.bfloat16), w2_ref[...],
                          preferred_element_type=jnp.float32)
        else:
            out = acc + b_ref[...]
        if apply_log_softmax:
            # Mask lane-padding columns out of the max / exp-sum.
            col = lax.broadcasted_iota(jnp.int32, out.shape, 1)
            valid = col < n_valid_out
            masked = jnp.where(valid, out, -jnp.inf)
            m = jnp.max(masked, axis=-1, keepdims=True)
            e = jnp.where(valid, jnp.exp(out - m), 0.0)
            lse = jnp.log(jnp.sum(e, axis=-1, keepdims=True))
            out = out - m - lse          # padded columns sliced off by wrapper
        o_ref[...] = out.astype(o_ref.dtype)

    if single_pass:
        epilogue(partial_sum())
    else:
        k = pl.program_id(1)

        @pl.when(k == 0)
        def _():
            acc_ref[...] = jnp.zeros_like(acc_ref)

        acc_ref[...] += partial_sum()

        @pl.when(k == pl.num_programs(1) - 1)
        def _():
            epilogue(acc_ref[...])


# ---------------------------------------------------------------------------
# Wrappers
# ---------------------------------------------------------------------------

def _round_up(x, m):
    return ((x + m - 1) // m) * m


def _pad2d(x, rows, cols):
    return jnp.pad(x, ((0, rows - x.shape[0]), (0, cols - x.shape[1])))


def gcn_layer(a, x, *, w1=None, b1=None, w2=None, bias=None,
              apply_log_softmax=False, n_valid_out=None,
              out_dtype=jnp.float32, tm=256, tk=512, single_pass=False):
    """out = epilogue(A @ X); X is VMEM-resident, only A row panels stream."""
    n_pad = a.shape[0]
    f_x = x.shape[1]
    fused = w1 is not None
    f_out = w2.shape[1] if fused else f_x
    if n_valid_out is None:
        n_valid_out = f_out

    tk_eff = n_pad if single_pass else tk

    if single_pass:
        grid = (n_pad // tm,)
        a_spec = pl.BlockSpec((tm, n_pad), lambda i: (i, 0))
        resident = lambda shape: pl.BlockSpec(shape, lambda i: (0, 0))
        out_spec = pl.BlockSpec((tm, f_out), lambda i: (i, 0))
        scratch = []
        dims = ("parallel",)
    else:
        grid = (n_pad // tm, n_pad // tk)
        a_spec = pl.BlockSpec((tm, tk), lambda i, k: (i, k))
        resident = lambda shape: pl.BlockSpec(shape, lambda i, k: (0, 0))
        out_spec = pl.BlockSpec((tm, f_out), lambda i, k: (i, 0))
        scratch = [pltpu.VMEM((tm, f_x), jnp.float32)]
        dims = ("parallel", "arbitrary")

    in_specs = [a_spec, resident((n_pad, f_x))]
    args = [a, x]
    if fused:
        in_specs += [resident(w1.shape), resident(b1.shape), resident(w2.shape)]
        args += [w1, b1, w2]
    else:
        in_specs.append(resident(bias.shape))
        args.append(bias)

    # Honest cost estimate: A streamed once, X resident (read once), small weights.
    flops = 2 * n_pad * n_pad * f_x
    if fused:
        hid = w1.shape[1]
        flops += 2 * n_pad * (f_x * hid + hid * f_out)
    bytes_accessed = int(
        a.size * a.dtype.itemsize + x.size * x.dtype.itemsize
        + sum(t.size * t.dtype.itemsize for t in args[2:])
        + n_pad * f_out * jnp.dtype(out_dtype).itemsize)
    transcendentals = n_pad * f_out if apply_log_softmax else 0

    # Explicit VMEM budget (double-buffered A panel + resident X + acc + out),
    # floored at 16 MiB, capped below v7x's 64 MiB physical VMEM.
    est = (2 * tm * tk_eff * 2                    # A panel, 2 buffers, bf16
           + 2 * n_pad * f_x * 2                  # resident feature operand
           + 2 * tm * f_out * jnp.dtype(out_dtype).itemsize
           + tm * f_x * 4                         # f32 accumulator
           + 6 * 128 * 128 * 2 + (1 << 18))       # weights / bias / slack
    vmem_limit = int(min(max(est + (4 << 20), 16 << 20), 56 << 20))

    kernel = functools.partial(
        _gcn_layer_kernel,
        tk=tk,
        single_pass=single_pass,
        fused_transform=fused,
        apply_log_softmax=apply_log_softmax,
        n_valid_out=n_valid_out,
    )

    return pl.pallas_call(
        kernel,
        out_shape=jax.ShapeDtypeStruct((n_pad, f_out), out_dtype),
        grid_spec=pltpu.PrefetchScalarGridSpec(
            num_scalar_prefetch=0,
            grid=grid,
            in_specs=in_specs,
            out_specs=out_spec,
            scratch_shapes=scratch,
        ),
        compiler_params=pltpu.CompilerParams(
            dimension_semantics=dims,
            vmem_limit_bytes=vmem_limit),
        cost_estimate=pl.CostEstimate(flops=flops,
                                      transcendentals=transcendentals,
                                      bytes_accessed=bytes_accessed),
    )(*args)


def normalized_adjacency(edge_index, num_nodes):
    """Dense GCN-normalized adjacency, ModelPretreatment semantics:
    remove self loops, add self loops, deg^{-1/2} norm with deg = degree(col).
    A[target=col, source=row]; duplicate edges accumulate (sum aggregation)."""
    row, col = edge_index[0], edge_index[1]
    keep = (row != col).astype(jnp.float32)                      # drop self loops
    deg = jnp.zeros((num_nodes,), jnp.float32).at[col].add(keep) + 1.0  # + self
    dis = deg ** -0.5
    w = dis[row] * dis[col] * keep
    a = jnp.zeros((num_nodes, num_nodes), jnp.float32).at[col, row].add(w)
    a = a + jnp.diag(dis * dis)                                  # self loops
    return a


def glorot(key, fan_in, fan_out):
    stdv = math.sqrt(6.0 / (fan_in + fan_out))
    return jax.random.uniform(key, (fan_in, fan_out), jnp.float32, -stdv, stdv)


def drop_gcn_forward(params, x, edge_index, *, tm_large=256, tk_large=512):
    """gnn1 -> relu -> gnn2 -> log_softmax (eval / drop_rate=0 semantics)."""
    n, f_in = x.shape
    hidden = params["w1"].shape[1]
    out_dim = params["w2"].shape[1]

    f_in_pad = _round_up(f_in, 128)
    hid_pad = _round_up(hidden, 128)
    out_pad = _round_up(out_dim, 128)

    # Small-graph fast path: full-width A row panels fit VMEM -> no K axis,
    # pad N only to a multiple of 128 (avoids the lcm(tm,tk) blow-up).
    n_pad128 = _round_up(n, 128)
    single_pass = n_pad128 <= 4096
    if single_pass:
        tm, tk = 128, None
        n_pad = n_pad128
    else:
        tm, tk = tm_large, tk_large
        n_pad = _round_up(n, math.lcm(tm, tk))

    # bf16 streaming operands (A is the N^2 HBM-bound term), f32 accumulation.
    a_pad = _pad2d(normalized_adjacency(edge_index, n).astype(jnp.bfloat16),
                   n_pad, n_pad)
    x_pad = _pad2d(x.astype(jnp.bfloat16), n_pad, f_in_pad)

    w1 = _pad2d(params["w1"].astype(jnp.bfloat16), f_in_pad, hid_pad)
    b1 = jnp.pad(params["b1"].astype(jnp.float32),
                 (0, hid_pad - hidden)).reshape(1, hid_pad)
    w2 = _pad2d(params["w2"].astype(jnp.bfloat16), hid_pad, out_pad)
    b2 = jnp.pad(params["b2"].astype(jnp.float32),
                 (0, out_pad - out_dim)).reshape(1, out_pad)

    # Layer 1 (fused epilogue): XW2 = relu((A @ X) @ W1 + b1) @ W2  -> bf16.
    xw2 = gcn_layer(a_pad, x_pad, w1=w1, b1=b1, w2=w2,
                    out_dtype=jnp.bfloat16, tm=tm, tk=tk,
                    single_pass=single_pass)

    # Layer 2: log_softmax(A @ XW2 + b2) over the valid out_dim columns.
    out = gcn_layer(a_pad, xw2, bias=b2, apply_log_softmax=True,
                    n_valid_out=out_dim, out_dtype=jnp.float32,
                    tm=tm, tk=tk, single_pass=single_pass)

    return out[:n, :out_dim]


# ---------------------------------------------------------------------------
# Demo
# ---------------------------------------------------------------------------

if __name__ == "__main__":
    key = jax.random.PRNGKey(0)
    k_x, k_w1, k_w2 = jax.random.split(key, 3)

    num_nodes, feature_num, hidden, output_num = 300, 12, 64, 7

    x = jax.random.normal(k_x, (num_nodes, feature_num), jnp.float32)

    # Deterministic graph: bidirectional ring + chords + one existing self loop.
    src = jnp.arange(num_nodes)
    dst = (src + 1) % num_nodes
    chord_src = jnp.arange(0, num_nodes, 7)
    chord_dst = (chord_src * 3 + 11) % num_nodes
    row = jnp.concatenate([src, dst, chord_src, chord_dst, jnp.array([0])])
    col = jnp.concatenate([dst, src, chord_dst, chord_src, jnp.array([0])])
    edge_index = jnp.stack([row, col]).astype(jnp.int32)

    params = {
        "w1": glorot(k_w1, feature_num, hidden),
        "b1": jnp.zeros((hidden,), jnp.float32),
        "w2": glorot(k_w2, hidden, output_num),
        "b2": jnp.zeros((output_num,), jnp.float32),
    }

    fwd = jax.jit(drop_gcn_forward)
    out = jax.block_until_ready(fwd(params, x, edge_index))

    # Pure-JAX f32 reference (same pretreatment / layer semantics).
    a_ref = normalized_adjacency(edge_index, num_nodes)
    h_ref = jnp.maximum((a_ref @ x) @ params["w1"] + params["b1"], 0.0)
    o_ref = (a_ref @ h_ref) @ params["w2"] + params["b2"]
    ref = jax.nn.log_softmax(o_ref, axis=-1)

    assert out.shape == (num_nodes, output_num)
    assert bool(jnp.all(jnp.isfinite(out)))
    row_sums = jnp.sum(jnp.exp(out), axis=-1)
    assert bool(jnp.all(jnp.abs(row_sums - 1.0) < 1e-3))
    assert bool(jnp.max(jnp.abs(out - ref)) < 0.25)   # bf16 streaming tolerance
    print("KERNEL_OK")
</pallas_src>

<mosaic_0001>
module attributes {stable_mosaic.version = 11 : i64} {
  func.func @_gcn_layer_kernel(%arg0: i32, %arg1: memref<128x384xbf16, #tpu.memory_space<vmem>>, %arg2: memref<384x128xbf16, #tpu.memory_space<vmem>>, %arg3: memref<1x128xf32, #tpu.memory_space<vmem>>, %arg4: memref<128x128xf32, #tpu.memory_space<vmem>>) attributes {dimension_semantics = [#tpu.dimension_semantics<parallel>], iteration_bounds = array<i64: 3>, scalar_prefetch = 0 : i64, scratch_operands = 0 : i64, tpu.core_type = #tpu.core_type<tc>, window_params = [{transform_indices = @transform_0, window_bounds = array<i64: 128, 384>}, {pipeline_mode = #tpu.pipeline_mode<synchronous>, transform_indices = @transform_1, window_bounds = array<i64: 384, 128>}, {pipeline_mode = #tpu.pipeline_mode<synchronous>, transform_indices = @transform_2, window_bounds = array<i64: 1, 128>}, {transform_indices = @transform_3, window_bounds = array<i64: 128, 128>}]} {
    %c0 = arith.constant 0 : index
    %c0_0 = arith.constant 0 : index
    %0 = vector.load %arg2[%c0, %c0_0] : memref<384x128xbf16, #tpu.memory_space<vmem>>, vector<384x128xbf16>
    %c0_1 = arith.constant 0 : index
    %c0_2 = arith.constant 0 : index
    %1 = vector.load %arg1[%c0_1, %c0_2] : memref<128x384xbf16, #tpu.memory_space<vmem>>, vector<128x384xbf16>
    %cst = arith.constant dense<0.000000e+00> : vector<128x128xf32>
    %2 = tpu.matmul %1, %0, %cst {dimension_numbers = #tpu.dot_dimension_numbers<[1], [0], [0], [1], [0, 0, 1, 1], [], []>} : vector<128x384xbf16>, vector<384x128xbf16>, vector<128x128xf32> -> vector<128x128xf32>
    %c0_3 = arith.constant 0 : index
    %c0_4 = arith.constant 0 : index
    %3 = vector.load %arg3[%c0_3, %c0_4] : memref<1x128xf32, #tpu.memory_space<vmem>>, vector<1x128xf32>
    %4 = vector.broadcast %3 : vector<1x128xf32> to vector<128x128xf32>
    %5 = arith.addf %2, %4 : vector<128x128xf32>
    %6 = tpu.iota {dimensions = array<i32: 1>} : vector<128x128xi32>
    %c7_i32 = arith.constant 7 : i32
    %7 = vector.broadcast %c7_i32 : i32 to vector<128x128xi32>
    %8 = arith.cmpi slt, %6, %7 : vector<128x128xi32>
    %cst_5 = arith.constant 0xFF800000 : f32
    %9 = vector.broadcast %cst_5 : f32 to vector<128x128xf32>
    %10 = arith.select %8, %5, %9 : vector<128x128xi1>, vector<128x128xf32>
    %cst_6 = arith.constant dense<0xFF800000> : vector<128xf32>
    %11 = vector.multi_reduction <maximumf>, %10, %cst_6 [1] : vector<128x128xf32> to vector<128xf32>
    %12 = vector.shape_cast %11 : vector<128xf32> to vector<128x1xf32>
    %13 = vector.broadcast %12 : vector<128x1xf32> to vector<128x128xf32>
    %14 = arith.subf %5, %13 : vector<128x128xf32>
    %15 = math.exp %14 : vector<128x128xf32>
    %cst_7 = arith.constant 0.000000e+00 : f32
    %16 = vector.broadcast %cst_7 : f32 to vector<128x128xf32>
    %17 = arith.select %8, %15, %16 : vector<128x128xi1>, vector<128x128xf32>
    %cst_8 = arith.constant dense<0.000000e+00> : vector<128xf32>
    %18 = vector.multi_reduction <add>, %17, %cst_8 [1] : vector<128x128xf32> to vector<128xf32>
    %19 = vector.shape_cast %18 : vector<128xf32> to vector<128x1xf32>
    %20 = math.log %19 : vector<128x1xf32>
    %21 = vector.broadcast %12 : vector<128x1xf32> to vector<128x128xf32>
    %22 = arith.subf %5, %21 : vector<128x128xf32>
    %23 = vector.broadcast %20 : vector<128x1xf32> to vector<128x128xf32>
    %24 = arith.subf %22, %23 : vector<128x128xf32>
    %c0_9 = arith.constant 0 : index
    %c0_10 = arith.constant 0 : index
    %25 = vector.load %arg4[%c0_9, %c0_10] : memref<128x128xf32, #tpu.memory_space<vmem>>, vector<128x128xf32>
    tpu.vector_store %arg4[%c0_9, %c0_10], %24 {strides = array<i32>} : memref<128x128xf32, #tpu.memory_space<vmem>>, vector<128x128xf32>,
    return
  }
  func.func @transform_0(%arg0: i32) -> (i32, i32) {
    %c0_i32 = arith.constant 0 : i32
    %c0_i32_0 = arith.constant 0 : i32
    return %arg0, %c0_i32 : i32, i32
  }
  func.func @transform_1(%arg0: i32) -> (i32, i32) {
    %c0_i32 = arith.constant 0 : i32
    %c0_i32_0 = arith.constant 0 : i32
    %c0_i32_1 = arith.constant 0 : i32
    return %c0_i32, %c0_i32_0 : i32, i32
  }
  func.func @transform_2(%arg0: i32) -> (i32, i32) {
    %c0_i32 = arith.constant 0 : i32
    %c0_i32_0 = arith.constant 0 : i32
    %c0_i32_1 = arith.constant 0 : i32
    return %c0_i32, %c0_i32_0 : i32, i32
  }
  func.func @transform_3(%arg0: i32) -> (i32, i32) {
    %c0_i32 = arith.constant 0 : i32
    %c0_i32_0 = arith.constant 0 : i32
    return %arg0, %c0_i32 : i32, i32
  }
}

module attributes {stable_mosaic.version = 11 : i64} {
  func.func @_gcn_layer_kernel(%arg0: i32, %arg1: memref<128x384xbf16, #tpu.memory_space<vmem>>, %arg2: memref<384x128xbf16, #tpu.memory_space<vmem>>, %arg3: memref<128x128xbf16, #tpu.memory_space<vmem>>, %arg4: memref<1x128xf32, #tpu.memory_space<vmem>>, %arg5: memref<128x128xbf16, #tpu.memory_space<vmem>>, %arg6: memref<128x128xbf16, #tpu.memory_space<vmem>>) attributes {dimension_semantics = [#tpu.dimension_semantics<parallel>], iteration_bounds = array<i64: 3>, scalar_prefetch = 0 : i64, scratch_operands = 0 : i64, tpu.core_type = #tpu.core_type<tc>, window_params = [{transform_indices = @transform_0, window_bounds = array<i64: 128, 384>}, {pipeline_mode = #tpu.pipeline_mode<synchronous>, transform_indices = @transform_1, window_bounds = array<i64: 384, 128>}, {pipeline_mode = #tpu.pipeline_mode<synchronous>, transform_indices = @transform_2, window_bounds = array<i64: 128, 128>}, {pipeline_mode = #tpu.pipeline_mode<synchronous>, transform_indices = @transform_3, window_bounds = array<i64: 1, 128>}, {pipeline_mode = #tpu.pipeline_mode<synchronous>, transform_indices = @transform_4, window_bounds = array<i64: 128, 128>}, {transform_indices = @transform_5, window_bounds = array<i64: 128, 128>}]} {
    %c0 = arith.constant 0 : index
    %c0_0 = arith.constant 0 : index
    %0 = vector.load %arg2[%c0, %c0_0] : memref<384x128xbf16, #tpu.memory_space<vmem>>, vector<384x128xbf16>
    %c0_1 = arith.constant 0 : index
    %c0_2 = arith.constant 0 : index
    %1 = vector.load %arg1[%c0_1, %c0_2] : memref<128x384xbf16, #tpu.memory_space<vmem>>, vector<128x384xbf16>
    %cst = arith.constant dense<0.000000e+00> : vector<128x128xf32>
    %2 = tpu.matmul %1, %0, %cst {dimension_numbers = #tpu.dot_dimension_numbers<[1], [0], [0], [1], [0, 0, 1, 1], [], []>} : vector<128x384xbf16>, vector<384x128xbf16>, vector<128x128xf32> -> vector<128x128xf32>
    %3 = arith.truncf %2 : vector<128x128xf32> to vector<128x128xbf16>
    %c0_3 = arith.constant 0 : index
    %c0_4 = arith.constant 0 : index
    %4 = vector.load %arg3[%c0_3, %c0_4] : memref<128x128xbf16, #tpu.memory_space<vmem>>, vector<128x128xbf16>
    %cst_5 = arith.constant dense<0.000000e+00> : vector<128x128xf32>
    %5 = tpu.matmul %3, %4, %cst_5 {dimension_numbers = #tpu.dot_dimension_numbers<[1], [0], [0], [1], [0, 0, 1, 1], [], []>} : vector<128x128xbf16>, vector<128x128xbf16>, vector<128x128xf32> -> vector<128x128xf32>
    %c0_6 = arith.constant 0 : index
    %c0_7 = arith.constant 0 : index
    %6 = vector.load %arg4[%c0_6, %c0_7] : memref<1x128xf32, #tpu.memory_space<vmem>>, vector<1x128xf32>
    %7 = vector.broadcast %6 : vector<1x128xf32> to vector<128x128xf32>
    %8 = arith.addf %5, %7 : vector<128x128xf32>
    %cst_8 = arith.constant 0.000000e+00 : f32
    %9 = vector.broadcast %cst_8 : f32 to vector<128x128xf32>
    %10 = arith.maximumf %8, %9 : vector<128x128xf32>
    %11 = arith.truncf %10 : vector<128x128xf32> to vector<128x128xbf16>
    %c0_9 = arith.constant 0 : index
    %c0_10 = arith.constant 0 : index
    %12 = vector.load %arg5[%c0_9, %c0_10] : memref<128x128xbf16, #tpu.memory_space<vmem>>, vector<128x128xbf16>
    %cst_11 = arith.constant dense<0.000000e+00> : vector<128x128xf32>
    %13 = tpu.matmul %11, %12, %cst_11 {dimension_numbers = #tpu.dot_dimension_numbers<[1], [0], [0], [1], [0, 0, 1, 1], [], []>} : vector<128x128xbf16>, vector<128x128xbf16>, vector<128x128xf32> -> vector<128x128xf32>
    %14 = arith.truncf %13 : vector<128x128xf32> to vector<128x128xbf16>
    %c0_12 = arith.constant 0 : index
    %c0_13 = arith.constant 0 : index
    %15 = vector.load %arg6[%c0_12, %c0_13] : memref<128x128xbf16, #tpu.memory_space<vmem>>, vector<128x128xbf16>
    tpu.vector_store %arg6[%c0_12, %c0_13], %14 {strides = array<i32>} : memref<128x128xbf16, #tpu.memory_space<vmem>>, vector<128x128xbf16>,
    return
  }
  func.func @transform_0(%arg0: i32) -> (i32, i32) {
    %c0_i32 = arith.constant 0 : i32
    %c0_i32_0 = arith.constant 0 : i32
    return %arg0, %c0_i32 : i32, i32
  }
  func.func @transform_1(%arg0: i32) -> (i32, i32) {
    %c0_i32 = arith.constant 0 : i32
    %c0_i32_0 = arith.constant 0 : i32
    %c0_i32_1 = arith.constant 0 : i32
    return %c0_i32, %c0_i32_0 : i32, i32
  }
  func.func @transform_2(%arg0: i32) -> (i32, i32) {
    %c0_i32 = arith.constant 0 : i32
    %c0_i32_0 = arith.constant 0 : i32
    %c0_i32_1 = arith.constant 0 : i32
    return %c0_i32, %c0_i32_0 : i32, i32
  }
  func.func @transform_3(%arg0: i32) -> (i32, i32) {
    %c0_i32 = arith.constant 0 : i32
    %c0_i32_0 = arith.constant 0 : i32
    %c0_i32_1 = arith.constant 0 : i32
    return %c0_i32, %c0_i32_0 : i32, i32
  }
  func.func @transform_4(%arg0: i32) -> (i32, i32) {
    %c0_i32 = arith.constant 0 : i32
    %c0_i32_0 = arith.constant 0 : i32
    %c0_i32_1 = arith.constant 0 : i32
    return %c0_i32, %c0_i32_0 : i32, i32
  }
  func.func @transform_5(%arg0: i32) -> (i32, i32) {
    %c0_i32 = arith.constant 0 : i32
    %c0_i32_0 = arith.constant 0 : i32
    return %arg0, %c0_i32 : i32, i32
  }
}

</mosaic_0001>

<bundles_post_ra>
// kernel: drop_gcn_forward.2
= control target key start
LH: loop header
LB: loop body
LE: loop exit
PB: predicated region body
PF: predicated region fallthrough
CT: control target
= control target key end

     0   :  { %s1773_s18 = smov 0   ;;  %s1967_s0 = inlined_call_operand.vmem [shape: bf16[384,384], index: 0, kind: input, shape index: {}]   ;;  %s1968_s1 = inlined_call_operand.vmem [shape: bf16[384,128], index: 1, kind: input, shape index: {}]   ;;  %s1969_s2 = inlined_call_operand.vmem [shape: bf16[128,128], index: 2, kind: input, shape index: {}]   ;;  %s1970_s3 = inlined_call_operand.vmem [shape: f32[1,128], index: 3, kind: input, shape index: {}]   ;;  %s1971_s4 = inlined_call_operand.vmem [shape: bf16[128,128], index: 4, kind: input, shape index: {}]   ;;  %s1972_s5 = inlined_call_operand.vmem [shape: bf16[384,128], index: 5, kind: output, shape index: {}]  }
   0x1 LB: > { %s1275_s19 = sadd.s32 4294967295, %s1741_s18   ;;  %p1279_p0 = scmp.ge.s32.totalorder %s1741_s18, 1  ;;  %s1741_s18 = sphi %s1773_s18, %s15_s18  }
   0x2   : > { %p189_p1 = scmp.lt.s32.totalorder %s1741_s18, 4 }
   0x4   : > { %p190_p2 = pnand %p1279_p0, %p189_p1 }
   0x5   : > { %v1663_v0 = vld [vmem:[%s1968_s1 + $0x40] sm:$0xff] (!%p190_p2)   ;;  %v1666_v3 = vld [vmem:[%s1968_s1 + $0x48] sm:$0xff] (!%p190_p2)   ;;  %v1669_v6 = vld [vmem:[%s1968_s1 + $0x50] sm:$0xff] (!%p190_p2)   ;;  %s1280_s11 = sshll.u32 (!%p190_p2), %s1275_s19, 4 }
   0x6   : > { %193 = sbr.rel (%p190_p2) target bundleno = 755 (0x2f3), region = 40  ;;  %v1664_v1 = vld [vmem:[%s1968_s1] sm:$0xff] (!%p190_p2)   ;;  %1430 = vmatprep.subr.bf16.mxu0 (!%p190_p2), %v1663_v0  ;;  %v1667_v4 = vld [vmem:[%s1968_s1 + $0x8] sm:$0xff] (!%p190_p2)   ;;  %v1670_v7 = vld [vmem:[%s1968_s1 + $0x10] sm:$0xff] (!%p190_p2)   ;;  %p219_p3 = scmp.lt.s32.totalorder (!%p190_p2), %s1280_s11, 47 }
   0x7   : > { %v1665_v2 = vld [vmem:[%s1968_s1 + $0x80] sm:$0xff] (!%p190_p2)   ;;  %1431 = vmatpush3.bf16.msra.mxu0 (!%p190_p2), %v1664_v1  ;;  %v1668_v5 = vld [vmem:[%s1968_s1 + $0x88] sm:$0xff] (!%p190_p2)   ;;  %v1671_v8 = vld [vmem:[%s1968_s1 + $0x90] sm:$0xff] (!%p190_p2)  }
   0x8   : > { %1542 = vmatprep.subr.bf16.mxu1 (!%p190_p2), %v1665_v2  ;;  %1432 = vmatprep.subr.bf16.mxu0 (!%p190_p2), %v1666_v3  ;;  %v1672_v9 = vld [vmem:[%s1968_s1 + $0x58] sm:$0xff] (!%p190_p2)   ;;  %v1675_v12 = vld [vmem:[%s1968_s1 + $0x60] sm:$0xff] (!%p190_p2)   ;;  %v1678_v15 = vld [vmem:[%s1968_s1 + $0x68] sm:$0xff] (!%p190_p2)  }
   0x9   : > { %1543 = vmatpush3.bf16.msra.mxu1 (!%p190_p2), %v1665_v2  ;;  %v1673_v10 = vld [vmem:[%s1968_s1 + $0x18] sm:$0xff] (!%p190_p2)   ;;  %v1677_v13 = vld [vmem:[%s1968_s1 + $0xa0] sm:$0xff] (!%p190_p2)   ;;  %v1680_v16 = vld [vmem:[%s1968_s1 + $0xa8] sm:$0xff] (!%p190_p2)  }
   0xa   : > { %1544 = vmatprep.subr.bf16.mxu1 (!%p190_p2), %v1668_v5  ;;  %v1674_v11 = vld [vmem:[%s1968_s1 + $0x98] sm:$0xff] (!%p190_p2)   ;;  %v1676_v14 = vld [vmem:[%s1968_s1 + $0x20] sm:$0xff] (!%p190_p2)   ;;  %v1679_v17 = vld [vmem:[%s1968_s1 + $0x28] sm:$0xff] (!%p190_p2)  }
   0xb   : > { %1433 = vmatpush3.bf16.msra.mxu0 (!%p190_p2), %v1667_v4  ;;  %v1681_v18 = vld [vmem:[%s1968_s1 + $0x70] sm:$0xff] (!%p190_p2)   ;;  %v1684_v21 = vld [vmem:[%s1968_s1 + $0x78] sm:$0xff] (!%p190_p2)   ;;  %v1719_v34 = vld [vmem:[%s1969_s2] sm:$0xff] (!%p190_p2)  }
   0xc   : > { %1434 = vmatprep.subr.bf16.mxu0 (!%p190_p2), %v1669_v6  ;;  %v1682_v19 = vld [vmem:[%s1968_s1 + $0x30] sm:$0xff] (!%p190_p2)   ;;  %v1686_v22 = vld [vmem:[%s1968_s1 + $0xb8] sm:$0xff] (!%p190_p2)   ;;  %v1720_v36 = vld [vmem:[%s1969_s2 + $0x8] sm:$0xff] (!%p190_p2)  }
   0xd   : > { %1545 = vmatpush3.bf16.msra.mxu1 %v1668_v5  ;;  %s1974_s11 = smov (!%p219_p3, %s1280_s11), 47  ;;  %v1683_v20 = vld [vmem:[%s1968_s1 + $0xb0] sm:$0xff]   ;;  %v1685_v25 = vld [vmem:[%s1968_s1 + $0x38] sm:$0xff]   ;;  %v1723_v52 = vld [vmem:[%s1969_s2 + $0x20] sm:$0xff]  }
   0xe   : > { %1546 = vmatprep.subr.bf16.mxu1 %v1671_v8  ;;  %s1654_s6 = smul.u32 12, %s1974_s11  ;;  %v1721_v39 = vld [vmem:[%s1969_s2 + $0x10] sm:$0xff]   ;;  %v1722_v41 = vld [vmem:[%s1969_s2 + $0x18] sm:$0xff]   ;;  %v1724_v53 = vld [vmem:[%s1969_s2 + $0x28] sm:$0xff]   ;;  %s1283_s13 = sshll.u32 %s1974_s11, 2 }
   0xf   : > { %1435 = vmatpush3.bf16.msra.mxu0 %v1670_v7  ;;  %v1725_v54 = vld [vmem:[%s1969_s2 + $0x30] sm:$0xff]   ;;  %v1726_v55 = vld [vmem:[%s1969_s2 + $0x38] sm:$0xff]   ;;  %v1727_v56 = vld [vmem:[%s1971_s4] sm:$0xff]   ;;  %s229_s16 = scalar_lea.vmem %s1972_s5, %s1283_s13 }
  0x10   : > { %1436 = vmatprep.subr.bf16.mxu0 %v1672_v9  ;;  %s1850_s20 = scalar_lea.vmem %s1967_s0, %s1654_s6  ;;  %v1728_v57 = vld [vmem:[%s1971_s4 + $0x8] sm:$0xff]   ;;  %v1918_v58 = vld [vmem:[%s1971_s4 + $0x10] sm:$0xff]   ;;  %v1924_v59 = vld [vmem:[%s1971_s4 + $0x18] sm:$0xff]  }
  0x11   : > { %1547 = vmatpush3.bf16.msra.mxu1 %v1671_v8  ;;  %v1689_v23 = vld [vmem:[%s1850_s20 + $0x4] ss:$12 sps:$4 sm:$0xff]   ;;  %v1690_v24 = vld [vmem:[%s1850_s20 + $0x8] ss:$12 sps:$4 sm:$0xff]   ;;  %v1687_v26 = vld [vmem:[%s1850_s20] ss:$12 sps:$4 sm:$0xff]  }
  0x12   : > { %1548 = vmatprep.subr.bf16.mxu1 %v1674_v11  ;;  %616 = vmatprep.mubr.bf16.mxu0 %v1689_v23  ;;  %v1692_v27 = vld [vmem:[%s1850_s20 + $0x1c] ss:$12 sps:$4 sm:$0xff]   ;;  %v1691_v28 = vld [vmem:[%s1850_s20 + $0x20] ss:$12 sps:$4 sm:$0xff]   ;;  %v1698_v29 = vld [vmem:[%s1850_s20 + $0x38] ss:$12 sps:$4 sm:$0xff]  }
  0x13   : > { %1437 = vmatpush3.bf16.msra.mxu0 %v1673_v10  ;;  %1558 = vmatprep.mubr.bf16.mxu1 %v1690_v24  ;;  %v1694_v30 = vld [vmem:[%s1850_s20 + $0x18] ss:$12 sps:$4 sm:$0xff]   ;;  %v1695_v31 = vld [vmem:[%s1850_s20 + $0x34] ss:$12 sps:$4 sm:$0xff]   ;;  %v1699_v32 = vld [vmem:[%s1850_s20 + $0x50] ss:$12 sps:$4 sm:$0xff]  }
  0x14   : > { %1438 = vmatprep.subr.bf16.mxu0 %v1675_v12  ;;  %v1706_v33 = vld [vmem:[%s1850_s20 + $0x68] ss:$12 sps:$4 sm:$0xff]   ;;  %v1697_v35 = vld [vmem:[%s1850_s20 + $0x30] ss:$12 sps:$4 sm:$0xff]   ;;  %v1700_v37 = vld [vmem:[%s1850_s20 + $0x4c] ss:$12 sps:$4 sm:$0xff]  }
  0x15   : > { %1549 = vmatpush3.bf16.msra.mxu1 %v1674_v11  ;;  %v1707_v38 = vld [vmem:[%s1850_s20 + $0x80] ss:$12 sps:$4 sm:$0xff]   ;;  %v1714_v40 = vld [vmem:[%s1850_s20 + $0x98] ss:$12 sps:$4 sm:$0xff]   ;;  %v1702_v42 = vld [vmem:[%s1850_s20 + $0x48] ss:$12 sps:$4 sm:$0xff]  }
  0x16   : > { %1550 = vmatprep.subr.bf16.mxu1 %v1677_v13  ;;  %v1703_v43 = vld [vmem:[%s1850_s20 + $0x64] ss:$12 sps:$4 sm:$0xff]   ;;  %v1705_v45 = vld [vmem:[%s1850_s20 + $0x60] ss:$12 sps:$4 sm:$0xff]   ;;  %v1708_v46 = vld [vmem:[%s1850_s20 + $0x7c] ss:$12 sps:$4 sm:$0xff]  }
  0x17   : > { %1439 = vmatpush3.bf16.msra.mxu0 %v1676_v14  ;;  %v1715_v44 = vld [vmem:[%s1850_s20 + $0xb0] ss:$12 sps:$4 sm:$0xff]   ;;  %v1710_v47 = vld [vmem:[%s1850_s20 + $0x78] ss:$12 sps:$4 sm:$0xff]   ;;  %v1711_v48 = vld [vmem:[%s1850_s20 + $0x94] ss:$12 sps:$4 sm:$0xff]  }
  0x18   : > { %1440 = vmatprep.subr.bf16.mxu0 %v1678_v15  ;;  %v1713_v49 = vld [vmem:[%s1850_s20 + $0x90] ss:$12 sps:$4 sm:$0xff]   ;;  %v1716_v50 = vld [vmem:[%s1850_s20 + $0xac] ss:$12 sps:$4 sm:$0xff]   ;;  %v1718_v51 = vld [vmem:[%s1850_s20 + $0xa8] ss:$12 sps:$4 sm:$0xff]  }
  0x19   : > { %1551 = vmatpush3.bf16.msra.mxu1 %v1677_v13  ;;  %v1931_v60 = vld [vmem:[%s1971_s4 + $0x20] sm:$0xff]   ;;  %v1938_v61 = vld [vmem:[%s1971_s4 + $0x28] sm:$0xff]  }
  0x1a   : > { %1552 = vmatprep.subr.bf16.mxu1 %v1680_v16 }
  0x1b   : > { %1441 = vmatpush3.bf16.msra.mxu0 %v1679_v17 }
  0x1c   : > { %1442 = vmatprep.subr.bf16.mxu0 %v1681_v18 }
  0x1d   : > { %1553 = vmatpush3.bf16.msra.mxu1 %v1680_v16 }
  0x1e   : > { %1554 = vmatprep.subr.bf16.mxu1 %v1683_v20 }
  0x1f   : > { %1443 = vmatpush3.bf16.msra.mxu0 %v1682_v19 }
  0x20   : > { %1444 = vmatprep.subr.bf16.mxu0 %v1684_v21 }
  0x21   : > { %1555 = vmatpush3.bf16.msra.mxu1 %v1683_v20 }
  0x22   : > { %1556 = vmatprep.subr.bf16.mxu1 %v1686_v22 }
  0x23   : > { %1445 = vmatpush3.bf16.msra.mxu0 %v1685_v25 }
  0x24   : > { %1606 = vmatprep.subr.bf16.mxu0 %v1727_v56 }
  0x25   : > { %1557 = vmatpush3.bf16.msra.mxu1 %v1686_v22 }
  0x26   : > { %617 = vmatmul.mubr.bf16.vlgmr.msra.gmra.mrb[0].mxu0 %v1687_v26  ;;  %1574 = vmatprep.subr.bf16.mxu1 %v1719_v34 }
  0x27   : > { %624 = vmatprep.mubr.bf16.mxu0 %v1692_v27  ;;  %1607 = vmatpush3.bf16.msra.mxu0 %v1727_v56 }
  0x28   : > { %1559 = vmatmul.mubr.bf16.vlgmr.msra.gmra.mrb[0].mxu1 %v1691_v28  ;;  %1608 = vmatprep.subr.bf16.mxu0 %v1728_v57 }
  0x29   : > { %1562 = vmatprep.mubr.bf16.mxu1 %v1698_v29  ;;  %1575 = vmatpush3.bf16.msra.mxu1 %v1719_v34 }
  0x2a   : > { %1576 = vmatprep.subr.bf16.mxu1 %v1720_v36 }
  0x2b   : > { %1609 = vmatpush3.bf16.msra.mxu0 %v1728_v57 }
  0x2c   : > { %1610 = vmatprep.subr.bf16.mxu0 %v1918_v58 }
  0x2d   : > { %1577 = vmatpush3.bf16.msra.mxu1 %v1720_v36 }
  0x2e   : > { %625 = vmatmul.mubr.bf16.gmra.mrb[4].mxu0 %v1694_v30  ;;  %1578 = vmatprep.subr.bf16.mxu1 %v1721_v39 }
  0x2f   : > { %632 = vmatprep.mubr.bf16.mxu0 %v1695_v31  ;;  %1611 = vmatpush3.bf16.msra.mxu0 %v1918_v58 }
  0x30   : > { %1563 = vmatmul.mubr.bf16.gmra.mrb[4].mxu1 %v1699_v32  ;;  %1612 = vmatprep.subr.bf16.mxu0 %v1924_v59 }
  0x31   : > { %1566 = vmatprep.mubr.bf16.mxu1 %v1706_v33  ;;  %1579 = vmatpush3.bf16.msra.mxu1 %v1721_v39 }
  0x32   : > { %1580 = vmatprep.subr.bf16.mxu1 %v1722_v41 }
  0x33   : > { %1613 = vmatpush3.bf16.msra.mxu0 %v1924_v59 }
  0x34   : > { %1614 = vmatprep.subr.bf16.mxu0 %v1931_v60 }
  0x35   : > { %1581 = vmatpush3.bf16.msra.mxu1 %v1722_v41 }
  0x36   : > { %633 = vmatmul.mubr.bf16.gmra.mrb[8].mxu0 %v1697_v35  ;;  %1582 = vmatprep.subr.bf16.mxu1 %v1723_v52 }
  0x37   : > { %640 = vmatprep.mubr.bf16.mxu0 %v1700_v37  ;;  %1615 = vmatpush3.bf16.msra.mxu0 %v1931_v60 }
  0x38   : > { %1567 = vmatmul.mubr.bf16.gmra.mrb[8].mxu1 %v1707_v38  ;;  %1616 = vmatprep.subr.bf16.mxu0 %v1938_v61 }
  0x39   : > { %1570 = vmatprep.mubr.bf16.mxu1 %v1714_v40  ;;  %1583 = vmatpush3.bf16.msra.mxu1 %v1723_v52 }
  0x3a   : > { %1584 = vmatprep.subr.bf16.mxu1 %v1724_v53 }
  0x3b   : > { %1617 = vmatpush3.bf16.msra.mxu0 %v1938_v61 }
  0x3d   : > { %1585 = vmatpush3.bf16.msra.mxu1 %v1724_v53 }
  0x3e   : > { %641 = vmatmul.mubr.bf16.gmra.mrb[12].mxu0 %v1702_v42  ;;  %1586 = vmatprep.subr.bf16.mxu1 %v1725_v54 }
  0x3f   : > { %648 = vmatprep.mubr.bf16.mxu0 %v1703_v43 }
  0x40   : > { %1571 = vmatmul.mubr.bf16.gmra.mrb[12].mxu1 %v1715_v44 }
  0x41   : > { %1587 = vmatpush3.bf16.msra.mxu1 %v1725_v54 }
  0x42   : > { %1588 = vmatprep.subr.bf16.mxu1 %v1726_v55 }
  0x45   : > { %1589 = vmatpush3.bf16.msra.mxu1 %v1726_v55 }
  0x46   : > { %649 = vmatmul.mubr.bf16.gmra.mrb[16].mxu0 %v1705_v45  ;;  %1638 = vmatprep.subr.bf16.mxu1 %v1727_v56 }
  0x47   : > { %656 = vmatprep.mubr.bf16.mxu0 %v1708_v46 }
  0x4e   : > { %657 = vmatmul.mubr.bf16.gmra.mrb[20].mxu0 %v1710_v47 }
  0x4f   : > { %664 = vmatprep.mubr.bf16.mxu0 %v1711_v48 }
  0x56   : > { %665 = vmatmul.mubr.bf16.gmra.mrb[24].mxu0 %v1713_v49 }
  0x57   : > { %672 = vmatprep.mubr.bf16.mxu0 %v1716_v50 }
  0x5e   : > { %673 = vmatmul.mubr.bf16.gmra.mrb[28].mxu0 %v1718_v51 }
  0xf9   : > { %v1446_v62 = vpop.f32.mrb[0].mxu0 }
  0xfa   : > { %v1447_v63 = vpop.f32.mrb[1].mxu0 }
  0xfb   : > { %v1448_v0 = vadd.f32 %v1447_v63, %v1446_v62  ;;  %v1449_v1 = vpop.f32.mrb[2].mxu0  ;;  %v1560_v2 = vpop.f32.mrb[0].mxu1 }
  0xfc   : > { %v1450_v3 = vpop.f32.mrb[3].mxu0  ;;  %v715_v4 = vpop.f32.mrb[1].mxu1 }
  0xfd   : > { %v1451_v5 = vadd.f32 %v1450_v3, %v1449_v1  ;;  %v716_v6 = vadd.f32 %v1448_v0, %v715_v4  ;;  %v1561_v7 = vpop.f32.mrb[2].mxu1 }
  0xfe   : > { %v718_v8 = vpop.f32.mrb[3].mxu1 }
  0xff   : > { %v719_v9 = vadd.f32 %v1451_v5, %v718_v8 }
 0x101   : > { %v778_v10 = vpack.c.bf16 %v719_v9, %v716_v6  ;;  %v1452_v11 = vpop.f32.mrb[4].mxu0 }
 0x102   : > { %v1453_v12 = vpop.f32.mrb[5].mxu0 }
 0x103   : > { %v1454_v13 = vadd.f32 %v1453_v12, %v1452_v11  ;;  %v1455_v14 = vpop.f32.mrb[6].mxu0  ;;  %1590 = vmatprep.mubr.bf16.mxu1 %v778_v10  ;;  %v1564_v15 = vpop.f32.mrb[4].mxu1 }
 0x104   : > { %v1456_v16 = vpop.f32.mrb[7].mxu0  ;;  %v731_v17 = vpop.f32.mrb[5].mxu1 }
 0x105   : > { %v724_v18 = vadd.f32 %v1560_v2, %v1454_v13  ;;  %v1457_v19 = vadd.f32 %v1456_v16, %v1455_v14  ;;  %v1565_v20 = vpop.f32.mrb[6].mxu1 }
 0x106   : > { %v734_v21 = vpop.f32.mrb[7].mxu1 }
 0x107   : > { %v727_v22 = vadd.f32 %v1561_v7, %v1457_v19 }
 0x109   : > { %v779_v23 = vpack.c.bf16 %v727_v22, %v724_v18  ;;  %v1458_v24 = vpop.f32.mrb[8].mxu0  ;;  %v1733_v22 = vld [vmem:[%s1971_s4 + $0x30] sm:$0xff]  }
 0x10a   : > { %v1459_v25 = vpop.f32.mrb[9].mxu0  ;;  %1618 = vmatprep.subr.bf16.mxu0 %v1733_v22 }
 0x10b   : > { %v1460_v26 = vadd.f32 %v1459_v25, %v1458_v24  ;;  %v1461_v27 = vpop.f32.mrb[10].mxu0  ;;  %1591 = vmatmul.mubr.bf16.vlgmr.msra.gmra.mrb[16].mxu1 %v779_v23  ;;  %v1568_v28 = vpop.f32.mrb[8].mxu1  ;;  %1619 = vmatpush3.bf16.msra.mxu0 %v1733_v22  ;;  %v1734_v23 = vld [vmem:[%s1971_s4 + $0x38] sm:$0xff]   ;;  %v1332_v24 = vld [vmem:[%s1970_s3] ss:$0 sm:$0xff] }
 0x10c   : > { %v1462_v29 = vpop.f32.mrb[11].mxu0  ;;  %v747_v30 = vpop.f32.mrb[9].mxu1  ;;  %1646 = vmatpush3.bf16.msra.mxu1 %v1727_v56  ;;  %1620 = vmatprep.subr.bf16.mxu0 %v1734_v23 }
 0x10d   : > { %v1463_v31 = vadd.f32 %v1462_v29, %v1461_v27  ;;  %v732_v32 = vadd.f32 %v1460_v26, %v731_v17  ;;  %v1569_v33 = vpop.f32.mrb[10].mxu1  ;;  %1639 = vmatprep.subr.bf16.mxu1 %v1728_v57 }
 0x10e   : > { %v750_v34 = vpop.f32.mrb[11].mxu1 }
 0x10f   : > { %v735_v35 = vadd.f32 %v1463_v31, %v734_v21  ;;  %1621 = vmatpush3.bf16.msra.mxu0 %v1734_v23 }
 0x110   : > { %1647 = vmatpush3.bf16.msra.mxu1 %v1728_v57 }
 0x111   : > { %v780_v36 = vpack.c.bf16 %v735_v35, %v732_v32  ;;  %v1464_v37 = vpop.f32.mrb[12].mxu0  ;;  %1640 = vmatprep.subr.bf16.mxu1 %v1918_v58 }
 0x112   : > { %v1465_v38 = vpop.f32.mrb[13].mxu0 }
 0x113   : > { %v1466_v39 = vadd.f32 %v1465_v38, %v1464_v37  ;;  %v1467_v40 = vpop.f32.mrb[14].mxu0  ;;  %1594 = vmatprep.mubr.bf16.mxu1 %v780_v36  ;;  %v1572_v41 = vpop.f32.mrb[12].mxu1 }
 0x114   : > { %v1468_v42 = vpop.f32.mrb[15].mxu0  ;;  %v763_v43 = vpop.f32.mrb[13].mxu1  ;;  %1648 = vmatpush3.bf16.msra.mxu1 %v1918_v58 }
 0x115   : > { %v740_v44 = vadd.f32 %v1564_v15, %v1466_v39  ;;  %v1469_v45 = vadd.f32 %v1468_v42, %v1467_v40  ;;  %v1573_v46 = vpop.f32.mrb[14].mxu1  ;;  %1641 = vmatprep.subr.bf16.mxu1 %v1924_v59 }
 0x116   : > { %v766_v47 = vpop.f32.mrb[15].mxu1 }
 0x117   : > { %v743_v48 = vadd.f32 %v1565_v20, %v1469_v45 }
 0x118   : > { %1649 = vmatpush3.bf16.msra.mxu1 %v1924_v59 }
 0x119   : > { %v1470_v49 = vpop.f32.mrb[16].mxu0  ;;  %v781_v50 = vpack.c.bf16 %v743_v48, %v740_v44  ;;  %1642 = vmatprep.subr.bf16.mxu1 %v1931_v60 }
 0x11a   : > { %v1471_v51 = vpop.f32.mrb[17].mxu0 }
 0x11b   : > { %v1472_v52 = vadd.f32 %v1471_v51, %v1470_v49  ;;  %v1473_v53 = vpop.f32.mrb[18].mxu0  ;;  %1595 = vmatmul.mubr.bf16.gmra.mrb[20].mxu1 %v781_v50 }
 0x11c   : > { %v1474_v54 = vpop.f32.mrb[19].mxu0  ;;  %1650 = vmatpush3.bf16.msra.mxu1 %v1931_v60 }
 0x11d   : > { %v1475_v55 = vadd.f32 %v1474_v54, %v1473_v53  ;;  %v748_v56 = vadd.f32 %v1472_v52, %v747_v30  ;;  %1643 = vmatprep.subr.bf16.mxu1 %v1938_v61 }
 0x11f   : > { %v751_v57 = vadd.f32 %v1475_v55, %v750_v34 }
 0x120   : > { %1651 = vmatpush3.bf16.msra.mxu1 %v1938_v61 }
 0x121   : > { %v782_v58 = vpack.c.bf16 %v751_v57, %v748_v56  ;;  %v1476_v59 = vpop.f32.mrb[20].mxu0  ;;  %1644 = vmatprep.subr.bf16.mxu1 %v1733_v22 }
 0x122   : > { %v1477_v62 = vpop.f32.mrb[21].mxu0 }
 0x123   : > { %v1478_v63 = vadd.f32 %v1477_v62, %v1476_v59  ;;  %v1479_v0 = vpop.f32.mrb[22].mxu0  ;;  %1598 = vmatprep.mubr.bf16.mxu1 %v782_v58 }
 0x124   : > { %v1480_v1 = vpop.f32.mrb[23].mxu0  ;;  %1652 = vmatpush3.bf16.msra.mxu1 %v1733_v22 }
 0x125   : > { %v756_v2 = vadd.f32 %v1568_v28, %v1478_v63  ;;  %v1481_v3 = vadd.f32 %v1480_v1, %v1479_v0  ;;  %1645 = vmatprep.subr.bf16.mxu1 %v1734_v23 }
 0x127   : > { %v759_v4 = vadd.f32 %v1569_v33, %v1481_v3 }
 0x128   : > { %1653 = vmatpush3.bf16.msra.mxu1 %v1734_v23 }
 0x129   : > { %v1482_v5 = vpop.f32.mrb[24].mxu0  ;;  %v783_v6 = vpack.c.bf16 %v759_v4, %v756_v2 }
 0x12a   : > { %v1483_v60 = vpop.f32.mrb[25].mxu0 }
 0x12b   : > { %v1484_v7 = vadd.f32 %v1483_v60, %v1482_v5  ;;  %v1485_v8 = vpop.f32.mrb[26].mxu0  ;;  %1599 = vmatmul.mubr.bf16.gmra.mrb[24].mxu1 %v783_v6 }
 0x12c   : > { %v1486_v9 = vpop.f32.mrb[27].mxu0 }
 0x12d   : > { %v1487_v10 = vadd.f32 %v1486_v9, %v1485_v8  ;;  %v764_v11 = vadd.f32 %v1484_v7, %v763_v43 }
 0x12f   : > { %v767_v61 = vadd.f32 %v1487_v10, %v766_v47 }
 0x131   : > { %v784_v12 = vpack.c.bf16 %v767_v61, %v764_v11  ;;  %v1488_v13 = vpop.f32.mrb[28].mxu0 }
 0x132   : > { %v1489_v14 = vpop.f32.mrb[29].mxu0 }
 0x133   : > { %v1490_v15 = vadd.f32 %v1489_v14, %v1488_v13  ;;  %v1491_v16 = vpop.f32.mrb[30].mxu0  ;;  %1602 = vmatprep.mubr.bf16.mxu1 %v784_v12 }
 0x134   : > { %v1492_v17 = vpop.f32.mrb[31].mxu0 }
 0x135   : > { %v772_v18 = vadd.f32 %v1572_v41, %v1490_v15  ;;  %v1493_v19 = vadd.f32 %v1492_v17, %v1491_v16 }
 0x137   : > { %v775_v20 = vadd.f32 %v1573_v46, %v1493_v19 }
 0x139   : > { %v785_v21 = vpack.c.bf16 %v775_v20, %v772_v18 }
 0x13b   : > { %1603 = vmatmul.mubr.bf16.gmra.mrb[28].mxu1 %v785_v21 }
 0x1de   : > { %v1592_v25 = vpop.f32.mrb[16].mxu1 }
 0x1df   : > { %v900_v26 = vadd.f32 %v1592_v25, %v1332_v24  ;;  %v891_v27 = vpop.f32.mrb[17].mxu1 }
 0x1e0   : > { %v892_v28 = vadd.f32 %v1332_v24, %v891_v27  ;;  %v1593_v29 = vpop.f32.mrb[18].mxu1 }
 0x1e1   : > { %v903_v30 = vadd.f32 %v1593_v29, %v1332_v24  ;;  %v894_v31 = vpop.f32.mrb[19].mxu1  ;;  %v956_v33 = vmax.f32 %v900_v26, 0.0 }
 0x1e2   : > { %v895_v32 = vadd.f32 %v1332_v24, %v894_v31  ;;  %v954_v35 = vmax.f32 %v892_v28, 0.0 }
 0x1e3   : > { %v957_v34 = vmax.f32 %v903_v30, 0.0 }
 0x1e4   : > { %v955_v36 = vmax.f32 %v895_v32, 0.0 }
 0x1e5   : > { %v971_v37 = vpack.c.bf16 %v957_v34, %v956_v33 }
 0x1e6   : > { %v970_v38 = vpack.c.bf16 %v955_v36, %v954_v35 }
 0x1e8   : > { %1622 = vmatprep.mubr.bf16.mxu0 %v970_v38 }
 0x1e9   : > { %1623 = vmatmul.mubr.bf16.vlgmr.msra.gmra.mrb[32].mxu0 %v971_v37 }
 0x1ee   : > { %v1596_v39 = vpop.f32.mrb[20].mxu1 }
 0x1ef   : > { %v916_v40 = vadd.f32 %v1596_v39, %v1332_v24  ;;  %v907_v41 = vpop.f32.mrb[21].mxu1 }
 0x1f0   : > { %v908_v42 = vadd.f32 %v1332_v24, %v907_v41  ;;  %v1597_v43 = vpop.f32.mrb[22].mxu1 }
 0x1f1   : > { %v919_v44 = vadd.f32 %v1597_v43, %v1332_v24  ;;  %v910_v45 = vpop.f32.mrb[23].mxu1  ;;  %v960_v47 = vmax.f32 %v916_v40, 0.0 }
 0x1f2   : > { %v911_v46 = vadd.f32 %v1332_v24, %v910_v45  ;;  %v958_v49 = vmax.f32 %v908_v42, 0.0 }
 0x1f3   : > { %v961_v48 = vmax.f32 %v919_v44, 0.0 }
 0x1f4   : > { %v959_v50 = vmax.f32 %v911_v46, 0.0 }
 0x1f5   : > { %v973_v51 = vpack.c.bf16 %v961_v48, %v960_v47 }
 0x1f6   : > { %v972_v52 = vpack.c.bf16 %v959_v50, %v958_v49 }
 0x1f8   : > { %1626 = vmatprep.mubr.bf16.mxu0 %v972_v52 }
 0x1f9   : > { %1627 = vmatmul.mubr.bf16.gmra.mrb[36].mxu0 %v973_v51 }
 0x1fe   : > { %v1600_v53 = vpop.f32.mrb[24].mxu1 }
 0x1ff   : > { %v932_v54 = vadd.f32 %v1600_v53, %v1332_v24  ;;  %v923_v55 = vpop.f32.mrb[25].mxu1 }
 0x200   : > { %v924_v56 = vadd.f32 %v1332_v24, %v923_v55  ;;  %v1601_v57 = vpop.f32.mrb[26].mxu1 }
 0x201   : > { %v935_v58 = vadd.f32 %v1601_v57, %v1332_v24  ;;  %v926_v59 = vpop.f32.mrb[27].mxu1  ;;  %v964_v63 = vmax.f32 %v932_v54, 0.0 }
 0x202   : > { %v927_v62 = vadd.f32 %v1332_v24, %v926_v59  ;;  %v962_v1 = vmax.f32 %v924_v56, 0.0 }
 0x203   : > { %v965_v0 = vmax.f32 %v935_v58, 0.0 }
 0x204   : > { %v963_v2 = vmax.f32 %v927_v62, 0.0 }
 0x205   : > { %v975_v3 = vpack.c.bf16 %v965_v0, %v964_v63 }
 0x206   : > { %v974_v4 = vpack.c.bf16 %v963_v2, %v962_v1 }
 0x208   : > { %1630 = vmatprep.mubr.bf16.mxu1 %v974_v4 }
 0x209   : > { %1631 = vmatmul.mubr.bf16.vlgmr.msra.gmra.mrb[32].mxu1 %v975_v3 }
 0x20e   : > { %v1604_v5 = vpop.f32.mrb[28].mxu1 }
 0x20f   : > { %v948_v6 = vadd.f32 %v1604_v5, %v1332_v24  ;;  %v939_v60 = vpop.f32.mrb[29].mxu1 }
 0x210   : > { %v940_v7 = vadd.f32 %v1332_v24, %v939_v60  ;;  %v1605_v8 = vpop.f32.mrb[30].mxu1 }
 0x211   : > { %v951_v9 = vadd.f32 %v1605_v8, %v1332_v24  ;;  %v942_v10 = vpop.f32.mrb[31].mxu1  ;;  %v968_v61 = vmax.f32 %v948_v6, 0.0 }
 0x212   : > { %v943_v11 = vadd.f32 %v1332_v24, %v942_v10  ;;  %v966_v13 = vmax.f32 %v940_v7, 0.0 }
 0x213   : > { %v969_v12 = vmax.f32 %v951_v9, 0.0 }
 0x214   : > { %v967_v14 = vmax.f32 %v943_v11, 0.0 }
 0x215   : > { %v977_v15 = vpack.c.bf16 %v969_v12, %v968_v61 }
 0x216   : > { %v976_v16 = vpack.c.bf16 %v967_v14, %v966_v13 }
 0x218   : > { %1634 = vmatprep.mubr.bf16.mxu1 %v976_v16 }
 0x219   : > { %1635 = vmatmul.mubr.bf16.gmra.mrb[36].mxu1 %v977_v15 }
 0x2bc   : > { %v1624_v17 = vpop.f32.mrb[32].mxu0 }
 0x2bd   : > { %v1076_v18 = vpop.f32.mrb[33].mxu0 }
 0x2be   : > { %v1625_v19 = vpop.f32.mrb[34].mxu0 }
 0x2bf   : > { %v1391_v20 = vpack.c.bf16 %v1625_v19, %v1624_v17  ;;  %v1079_v21 = vpop.f32.mrb[35].mxu0 }
 0x2c0   : > { %v1386_v22 = vpack.c.bf16 %v1079_v21, %v1076_v18 }
 0x2c1   : > { %1423 = vst [vmem:[%s229_s16 + $0x8] sm:$0xff] %v1391_v20  }
 0x2c2   : > { %1387 = vst [vmem:[%s229_s16] sm:$0xff] %v1386_v22  }
 0x2cc   : > { %v1628_v23 = vpop.f32.mrb[36].mxu0 }
 0x2cd   : > { %v1092_v24 = vpop.f32.mrb[37].mxu0 }
 0x2ce   : > { %v1629_v25 = vpop.f32.mrb[38].mxu0 }
 0x2cf   : > { %v1401_v26 = vpack.c.bf16 %v1629_v25, %v1628_v23  ;;  %v1095_v27 = vpop.f32.mrb[39].mxu0 }
 0x2d0   : > { %v1396_v28 = vpack.c.bf16 %v1095_v27, %v1092_v24 }
 0x2d1   : > { %1425 = vst [vmem:[%s229_s16 + $0x18] sm:$0xff] %v1401_v26  }
 0x2d2   : > { %1424 = vst [vmem:[%s229_s16 + $0x10] sm:$0xff] %v1396_v28  }
 0x2dc   : > { %v1632_v29 = vpop.f32.mrb[32].mxu1 }
 0x2dd   : > { %v1108_v30 = vpop.f32.mrb[33].mxu1 }
 0x2de   : > { %v1633_v31 = vpop.f32.mrb[34].mxu1 }
 0x2df   : > { %v1411_v32 = vpack.c.bf16 %v1633_v31, %v1632_v29  ;;  %v1111_v33 = vpop.f32.mrb[35].mxu1 }
 0x2e0   : > { %v1406_v34 = vpack.c.bf16 %v1111_v33, %v1108_v30 }
 0x2e1   : > { %1427 = vst [vmem:[%s229_s16 + $0x28] sm:$0xff] %v1411_v32  }
 0x2e2   : > { %1426 = vst [vmem:[%s229_s16 + $0x20] sm:$0xff] %v1406_v34  }
 0x2ec   : > { %v1636_v35 = vpop.f32.mrb[36].mxu1 }
 0x2ed   : > { %v1124_v36 = vpop.f32.mrb[37].mxu1 }
 0x2ee   : > { %v1637_v37 = vpop.f32.mrb[38].mxu1 }
 0x2ef   : > { %v1421_v38 = vpack.c.bf16 %v1637_v37, %v1636_v35  ;;  %v1127_v39 = vpop.f32.mrb[39].mxu1 }
 0x2f0   : > { %v1416_v40 = vpack.c.bf16 %v1127_v39, %v1124_v36 }
 0x2f1   : > { %1429 = vst [vmem:[%s229_s16 + $0x38] sm:$0xff] %v1421_v38  }
 0x2f2   : > { %1428 = vst [vmem:[%s229_s16 + $0x30] sm:$0xff] %v1416_v40  }
 0x2f3 PF: > { %s15_s18 = sadd.s32 1, %s1741_s18  }
 0x2f4   : > { %p12_p4 = scmp.ge.s32.totalorder %s15_s18, 5  }
 0x2f6   :  { %14 = sbr.rel (!%p12_p4) target bundleno = 1 (0x1), region = 70 }

// kernel: drop_gcn_forward.3
= control target key start
LH: loop header
LB: loop body
LE: loop exit
PB: predicated region body
PF: predicated region fallthrough
CT: control target
= control target key end

     0   :  { %s1327_s12 = smov 0   ;;  %s1683_s0 = inlined_call_operand.vmem [shape: bf16[384,384], index: 0, kind: input, shape index: {}]   ;;  %s1684_s1 = inlined_call_operand.vmem [shape: bf16[384,128], index: 1, kind: input, shape index: {}]   ;;  %s1685_s2 = inlined_call_operand.vmem [shape: f32[1,128], index: 2, kind: input, shape index: {}]   ;;  %s1686_s3 = inlined_call_operand.vmem [shape: f32[384,128], index: 3, kind: output, shape index: {}]  }
   0x1 LB: > { %s998_s13 = sadd.s32 4294967295, %s1305_s12   ;;  %p1002_p0 = scmp.ge.s32.totalorder %s1305_s12, 1  ;;  %s1305_s12 = sphi %s1327_s12, %s13_s12  }
   0x2   : > { %p139_p1 = scmp.lt.s32.totalorder %s1305_s12, 4 }
   0x4   : > { %p140_p2 = pnand %p1002_p0, %p139_p1 }
   0x5   : > { %v1179_v0 = vld [vmem:[%s1684_s1 + $0x40] sm:$0xff] (!%p140_p2)   ;;  %v1181_v2 = vld [vmem:[%s1684_s1 + $0x48] sm:$0xff] (!%p140_p2)   ;;  %v1184_v5 = vld [vmem:[%s1684_s1 + $0x50] sm:$0xff] (!%p140_p2)   ;;  %s1003_s28 = sshll.u32 (!%p140_p2), %s998_s13, 4  ;;  %v731_v48 = vlaneseq (!%p140_p2) }
   0x6   : > { %143 = sbr.rel (%p140_p2) target bundleno = 632 (0x278), region = 32  ;;  %v1180_v1 = vld [vmem:[%s1684_s1] sm:$0xff] (!%p140_p2)   ;;  %1058 = vmatprep.subr.bf16.mxu0 (!%p140_p2), %v1179_v0  ;;  %v1183_v4 = vld [vmem:[%s1684_s1 + $0x8] sm:$0xff] (!%p140_p2)   ;;  %v1186_v7 = vld [vmem:[%s1684_s1 + $0x10] sm:$0xff] (!%p140_p2)   ;;  %p165_p3 = scmp.lt.s32.totalorder (!%p140_p2), %s1003_s28, 47 }
   0x7   : > { %1059 = vmatpush3.bf16.msra.mxu0 (!%p140_p2), %v1180_v1  ;;  %v1182_v3 = vld [vmem:[%s1684_s1 + $0x80] sm:$0xff] (!%p140_p2)   ;;  %v1185_v6 = vld [vmem:[%s1684_s1 + $0x88] sm:$0xff] (!%p140_p2)   ;;  %v1187_v8 = vld [vmem:[%s1684_s1 + $0x58] sm:$0xff] (!%p140_p2)   ;;  %v1444_v52 = vand.u32 (!%p140_p2), 127, %v731_v48 }
   0x8   : > { %1060 = vmatprep.subr.bf16.mxu0 (!%p140_p2), %v1181_v2  ;;  %1138 = vmatprep.subr.bf16.mxu1 (!%p140_p2), %v1182_v3  ;;  %v1188_v9 = vld [vmem:[%s1684_s1 + $0x90] sm:$0xff] (!%p140_p2)   ;;  %v1189_v10 = vld [vmem:[%s1684_s1 + $0x18] sm:$0xff] (!%p140_p2)   ;;  %v1190_v11 = vld [vmem:[%s1684_s1 + $0x60] sm:$0xff] (!%p140_p2)  }
   0x9   : > { %1139 = vmatpush3.bf16.msra.mxu1 (!%p140_p2), %v1182_v3  ;;  %v1191_v12 = vld [vmem:[%s1684_s1 + $0x98] sm:$0xff] (!%p140_p2)   ;;  %v1192_v13 = vld [vmem:[%s1684_s1 + $0x20] sm:$0xff] (!%p140_p2)   ;;  %v1193_v15 = vld [vmem:[%s1684_s1 + $0x68] sm:$0xff] (!%p140_p2)   ;;  %vm733_vm0 = vcmp.lt.s32.totalorder (!%p140_p2), %v1444_v52, 7 }
   0xa   : > { %1140 = vmatprep.subr.bf16.mxu1 (!%p140_p2), %v1185_v6  ;;  %v1194_v14 = vld [vmem:[%s1684_s1 + $0xa0] sm:$0xff] (!%p140_p2)   ;;  %v1195_v16 = vld [vmem:[%s1684_s1 + $0x28] sm:$0xff] (!%p140_p2)   ;;  %v1196_v18 = vld [vmem:[%s1684_s1 + $0x70] sm:$0xff] (!%p140_p2)  }
   0xb   : > { %1061 = vmatpush3.bf16.msra.mxu0 (!%p140_p2), %v1183_v4  ;;  %v1197_v17 = vld [vmem:[%s1684_s1 + $0xa8] sm:$0xff] (!%p140_p2)   ;;  %v1198_v19 = vld [vmem:[%s1684_s1 + $0x30] sm:$0xff] (!%p140_p2)   ;;  %v1199_v20 = vld [vmem:[%s1684_s1 + $0x78] sm:$0xff] (!%p140_p2)  }
   0xc   : > { %1062 = vmatprep.subr.bf16.mxu0 (!%p140_p2), %v1184_v5  ;;  %v1200_v21 = vld [vmem:[%s1684_s1 + $0xb0] sm:$0xff] (!%p140_p2)   ;;  %v1201_v23 = vld [vmem:[%s1684_s1 + $0x38] sm:$0xff] (!%p140_p2)   ;;  %v1442_v51 = vld [vmem:[%s1685_s2] ss:$0 sm:$0xff] (!%p140_p2) }
   0xd   : > { %1141 = vmatpush3.bf16.msra.mxu1 %v1185_v6  ;;  %s1688_s28 = smov (!%p165_p3, %s1003_s28), 47  ;;  %v1205_v25 = vld [vmem:[%s1684_s1 + $0xb8] sm:$0xff]  }
   0xe   : > { %1142 = vmatprep.subr.bf16.mxu1 %v1188_v9  ;;  %s1170_s21 = smul.u32 12, %s1688_s28  ;;  %s1006_s18 = sshll.u32 %s1688_s28, 3 }
   0xf   : > { %1063 = vmatpush3.bf16.msra.mxu0 %v1186_v7 }
  0x10   : > { %1064 = vmatprep.subr.bf16.mxu0 %v1187_v8  ;;  %s1401_s6 = scalar_lea.vmem %s1683_s0, %s1170_s21  ;;  %s1646_s21 = scalar_lea.vmem %s1686_s3, %s1006_s18 }
  0x11   : > { %1143 = vmatpush3.bf16.msra.mxu1 %v1188_v9  ;;  %v1204_v22 = vld [vmem:[%s1401_s6 + $0x4] ss:$12 sps:$4 sm:$0xff]   ;;  %v1206_v24 = vld [vmem:[%s1401_s6 + $0x8] ss:$12 sps:$4 sm:$0xff]   ;;  %v1202_v26 = vld [vmem:[%s1401_s6] ss:$12 sps:$4 sm:$0xff]  }
  0x12   : > { %1144 = vmatprep.subr.bf16.mxu1 %v1191_v12  ;;  %569 = vmatprep.mubr.bf16.mxu0 %v1204_v22  ;;  %v1208_v27 = vld [vmem:[%s1401_s6 + $0x1c] ss:$12 sps:$4 sm:$0xff]   ;;  %v1207_v28 = vld [vmem:[%s1401_s6 + $0x20] ss:$12 sps:$4 sm:$0xff]   ;;  %v1214_v29 = vld [vmem:[%s1401_s6 + $0x38] ss:$12 sps:$4 sm:$0xff]  }
  0x13   : > { %1065 = vmatpush3.bf16.msra.mxu0 %v1189_v10  ;;  %1154 = vmatprep.mubr.bf16.mxu1 %v1206_v24  ;;  %v1210_v30 = vld [vmem:[%s1401_s6 + $0x18] ss:$12 sps:$4 sm:$0xff]   ;;  %v1211_v31 = vld [vmem:[%s1401_s6 + $0x34] ss:$12 sps:$4 sm:$0xff]   ;;  %v1215_v32 = vld [vmem:[%s1401_s6 + $0x50] ss:$12 sps:$4 sm:$0xff]  }
  0x14   : > { %1066 = vmatprep.subr.bf16.mxu0 %v1190_v11  ;;  %v1222_v33 = vld [vmem:[%s1401_s6 + $0x68] ss:$12 sps:$4 sm:$0xff]   ;;  %v1213_v34 = vld [vmem:[%s1401_s6 + $0x30] ss:$12 sps:$4 sm:$0xff]   ;;  %v1216_v35 = vld [vmem:[%s1401_s6 + $0x4c] ss:$12 sps:$4 sm:$0xff]  }
  0x15   : > { %1145 = vmatpush3.bf16.msra.mxu1 %v1191_v12  ;;  %v1223_v36 = vld [vmem:[%s1401_s6 + $0x80] ss:$12 sps:$4 sm:$0xff]   ;;  %v1230_v37 = vld [vmem:[%s1401_s6 + $0x98] ss:$12 sps:$4 sm:$0xff]   ;;  %v1218_v38 = vld [vmem:[%s1401_s6 + $0x48] ss:$12 sps:$4 sm:$0xff]  }
  0x16   : > { %1146 = vmatprep.subr.bf16.mxu1 %v1194_v14  ;;  %v1219_v39 = vld [vmem:[%s1401_s6 + $0x64] ss:$12 sps:$4 sm:$0xff]   ;;  %v1221_v41 = vld [vmem:[%s1401_s6 + $0x60] ss:$12 sps:$4 sm:$0xff]   ;;  %v1224_v42 = vld [vmem:[%s1401_s6 + $0x7c] ss:$12 sps:$4 sm:$0xff]  }
  0x17   : > { %1067 = vmatpush3.bf16.msra.mxu0 %v1192_v13  ;;  %v1231_v40 = vld [vmem:[%s1401_s6 + $0xb0] ss:$12 sps:$4 sm:$0xff]   ;;  %v1226_v43 = vld [vmem:[%s1401_s6 + $0x78] ss:$12 sps:$4 sm:$0xff]   ;;  %v1227_v44 = vld [vmem:[%s1401_s6 + $0x94] ss:$12 sps:$4 sm:$0xff]  }
  0x18   : > { %1068 = vmatprep.subr.bf16.mxu0 %v1193_v15  ;;  %v1229_v45 = vld [vmem:[%s1401_s6 + $0x90] ss:$12 sps:$4 sm:$0xff]   ;;  %v1232_v46 = vld [vmem:[%s1401_s6 + $0xac] ss:$12 sps:$4 sm:$0xff]   ;;  %v1234_v47 = vld [vmem:[%s1401_s6 + $0xa8] ss:$12 sps:$4 sm:$0xff]  }
  0x19   : > { %1147 = vmatpush3.bf16.msra.mxu1 %v1194_v14 }
  0x1a   : > { %1148 = vmatprep.subr.bf16.mxu1 %v1197_v17 }
  0x1b   : > { %1069 = vmatpush3.bf16.msra.mxu0 %v1195_v16 }
  0x1c   : > { %1070 = vmatprep.subr.bf16.mxu0 %v1196_v18 }
  0x1d   : > { %1149 = vmatpush3.bf16.msra.mxu1 %v1197_v17 }
  0x1e   : > { %1150 = vmatprep.subr.bf16.mxu1 %v1200_v21 }
  0x1f   : > { %1071 = vmatpush3.bf16.msra.mxu0 %v1198_v19 }
  0x20   : > { %1072 = vmatprep.subr.bf16.mxu0 %v1199_v20 }
  0x21   : > { %1151 = vmatpush3.bf16.msra.mxu1 %v1200_v21 }
  0x22   : > { %1152 = vmatprep.subr.bf16.mxu1 %v1205_v25 }
  0x23   : > { %1073 = vmatpush3.bf16.msra.mxu0 %v1201_v23 }
  0x25   : > { %1153 = vmatpush3.bf16.msra.mxu1 %v1205_v25 }
  0x26   : > { %570 = vmatmul.mubr.bf16.vlgmr.msra.gmra.mrb[0].mxu0 %v1202_v26 }
  0x27   : > { %577 = vmatprep.mubr.bf16.mxu0 %v1208_v27 }
  0x28   : > { %1155 = vmatmul.mubr.bf16.vlgmr.msra.gmra.mrb[0].mxu1 %v1207_v28 }
  0x29   : > { %1158 = vmatprep.mubr.bf16.mxu1 %v1214_v29 }
  0x2e   : > { %578 = vmatmul.mubr.bf16.gmra.mrb[4].mxu0 %v1210_v30 }
  0x2f   : > { %585 = vmatprep.mubr.bf16.mxu0 %v1211_v31 }
  0x30   : > { %1159 = vmatmul.mubr.bf16.gmra.mrb[4].mxu1 %v1215_v32 }
  0x31   : > { %1162 = vmatprep.mubr.bf16.mxu1 %v1222_v33 }
  0x36   : > { %586 = vmatmul.mubr.bf16.gmra.mrb[8].mxu0 %v1213_v34 }
  0x37   : > { %593 = vmatprep.mubr.bf16.mxu0 %v1216_v35 }
  0x38   : > { %1163 = vmatmul.mubr.bf16.gmra.mrb[8].mxu1 %v1223_v36 }
  0x39   : > { %1166 = vmatprep.mubr.bf16.mxu1 %v1230_v37 }
  0x3e   : > { %594 = vmatmul.mubr.bf16.gmra.mrb[12].mxu0 %v1218_v38 }
  0x3f   : > { %601 = vmatprep.mubr.bf16.mxu0 %v1219_v39 }
  0x40   : > { %1167 = vmatmul.mubr.bf16.gmra.mrb[12].mxu1 %v1231_v40 }
  0x46   : > { %602 = vmatmul.mubr.bf16.gmra.mrb[16].mxu0 %v1221_v41 }
  0x47   : > { %609 = vmatprep.mubr.bf16.mxu0 %v1224_v42 }
  0x4e   : > { %610 = vmatmul.mubr.bf16.gmra.mrb[20].mxu0 %v1226_v43 }
  0x4f   : > { %617 = vmatprep.mubr.bf16.mxu0 %v1227_v44 }
  0x56   : > { %618 = vmatmul.mubr.bf16.gmra.mrb[24].mxu0 %v1229_v45 }
  0x57   : > { %625 = vmatprep.mubr.bf16.mxu0 %v1232_v46 }
  0x5e   : > { %626 = vmatmul.mubr.bf16.gmra.mrb[28].mxu0 %v1234_v47 }
  0xf9   : > { %v1074_v49 = vpop.f32.mrb[0].mxu0 }
  0xfa   : > { %v1075_v50 = vpop.f32.mrb[1].mxu0 }
  0xfb   : > { %v1076_v53 = vadd.f32 %v1075_v50, %v1074_v49  ;;  %v1077_v54 = vpop.f32.mrb[2].mxu0  ;;  %v1156_v56 = vpop.f32.mrb[0].mxu1 }
  0xfc   : > { %v1078_v55 = vpop.f32.mrb[3].mxu0  ;;  %v668_v59 = vpop.f32.mrb[1].mxu1 }
  0xfd   : > { %v1079_v57 = vadd.f32 %v1078_v55, %v1077_v54  ;;  %v572_v58 = vadd.f32 %v1076_v53, %v1442_v51  ;;  %v1157_v60 = vpop.f32.mrb[2].mxu1 }
  0xfe   : > { %v671_v63 = vpop.f32.mrb[3].mxu1 }
  0xff   : > { %v1448_v61 = vadd.f32 %v668_v59, %v572_v58  ;;  %v575_v62 = vadd.f32 %v1079_v57, %v1442_v51 }
 0x101   : > { %v1451_v0 = vadd.f32 %v671_v63, %v575_v62  ;;  %v1080_v1 = vpop.f32.mrb[4].mxu0  ;;  %v734_v2 = vsel %vm733_vm0, %v1448_v61, -inf }
 0x102   : > { %v1081_v3 = vpop.f32.mrb[5].mxu0  ;;  %750 = vmax.xlane.f32.xlu0 %v734_v2 }
 0x103   : > { %v1082_v4 = vadd.f32 %v1081_v3, %v1080_v1  ;;  %v1083_v5 = vpop.f32.mrb[6].mxu0  ;;  %v1160_v7 = vpop.f32.mrb[4].mxu1  ;;  %v735_v10 = vsel %vm733_vm0, %v1451_v0, -inf }
 0x104   : > { %v1084_v6 = vpop.f32.mrb[7].mxu0  ;;  %v684_v11 = vpop.f32.mrb[5].mxu1 }
 0x105   : > { %v580_v8 = vadd.f32 %v1082_v4, %v1442_v51  ;;  %v1085_v9 = vadd.f32 %v1084_v6, %v1083_v5  ;;  %v1161_v12 = vpop.f32.mrb[6].mxu1 }
 0x106   : > { %752 = vmax.xlane.f32.xlu0 %v735_v10  ;;  %v687_v15 = vpop.f32.mrb[7].mxu1 }
 0x107   : > { %v583_v13 = vadd.f32 %v1085_v9, %v1442_v51  ;;  %v1461_v14 = vadd.f32 %v1156_v56, %v580_v8 }
 0x109   : > { %v1086_v16 = vpop.f32.mrb[8].mxu0  ;;  %v736_v17 = vsel %vm733_vm0, %v1461_v14, -inf  ;;  %v1466_v18 = vadd.f32 %v1157_v60, %v583_v13 }
 0x10a   : > { %v1087_v19 = vpop.f32.mrb[9].mxu0  ;;  %754 = vmax.xlane.f32.xlu1 %v736_v17 }
 0x10b   : > { %v1088_v20 = vadd.f32 %v1087_v19, %v1086_v16  ;;  %v1089_v21 = vpop.f32.mrb[10].mxu0  ;;  %v1164_v23 = vpop.f32.mrb[8].mxu1  ;;  %v737_v26 = vsel %vm733_vm0, %v1466_v18, -inf }
 0x10c   : > { %v1090_v22 = vpop.f32.mrb[11].mxu0  ;;  %v700_v27 = vpop.f32.mrb[9].mxu1 }
 0x10d   : > { %v1091_v24 = vadd.f32 %v1090_v22, %v1089_v21  ;;  %v588_v25 = vadd.f32 %v1088_v20, %v1442_v51  ;;  %v1165_v28 = vpop.f32.mrb[10].mxu1 }
 0x10e   : > { %756 = vmax.xlane.f32.xlu1 %v737_v26  ;;  %v703_v31 = vpop.f32.mrb[11].mxu1 }
 0x10f   : > { %v1472_v29 = vadd.f32 %v684_v11, %v588_v25  ;;  %v591_v30 = vadd.f32 %v1091_v24, %v1442_v51 }
 0x111   : > { %v1475_v32 = vadd.f32 %v687_v15, %v591_v30  ;;  %v1092_v33 = vpop.f32.mrb[12].mxu0  ;;  %v738_v34 = vsel %vm733_vm0, %v1472_v29, -inf }
 0x112   : > { %v1093_v35 = vpop.f32.mrb[13].mxu0  ;;  %758 = vmax.xlane.f32.xlu0 %v738_v34 }
 0x113   : > { %v1094_v36 = vadd.f32 %v1093_v35, %v1092_v33  ;;  %v1095_v37 = vpop.f32.mrb[14].mxu0  ;;  %v739_v38 = vsel %vm733_vm0, %v1475_v32, -inf  ;;  %v1483_v40 = vpop.f32.mrb[12].mxu1 }
 0x114   : > { %v1096_v39 = vpop.f32.mrb[15].mxu0  ;;  %760 = vmax.xlane.f32.xlu1 %v739_v38  ;;  %v716_v43 = vpop.f32.mrb[13].mxu1 }
 0x115   : > { %v596_v41 = vadd.f32 %v1094_v36, %v1442_v51  ;;  %v1097_v42 = vadd.f32 %v1096_v39, %v1095_v37  ;;  %v1169_v44 = vpop.f32.mrb[14].mxu1 }
 0x116   : > { %v719_v47 = vpop.f32.mrb[15].mxu1 }
 0x117   : > { %v599_v45 = vadd.f32 %v1097_v42, %v1442_v51  ;;  %v1487_v46 = vadd.f32 %v1160_v7, %v596_v41 }
 0x119   : > { %v1098_v48 = vpop.f32.mrb[16].mxu0  ;;  %v740_v49 = vsel %vm733_vm0, %v1487_v46, -inf  ;;  %v1492_v50 = vadd.f32 %v1161_v12, %v599_v45 }
 0x11a   : > { %v1099_v53 = vpop.f32.mrb[17].mxu0  ;;  %762 = vmax.xlane.f32.xlu0 %v740_v49 }
 0x11b   : > { %v1100_v54 = vadd.f32 %v1099_v53, %v1098_v48  ;;  %v1101_v55 = vpop.f32.mrb[18].mxu0  ;;  %v741_v56 = vsel %vm733_vm0, %v1492_v50, -inf }
 0x11c   : > { %v1102_v57 = vpop.f32.mrb[19].mxu0  ;;  %764 = vmax.xlane.f32.xlu1 %v741_v56 }
 0x11d   : > { %v1103_v58 = vadd.f32 %v1102_v57, %v1101_v55  ;;  %v604_v59 = vadd.f32 %v1100_v54, %v1442_v51 }
 0x11f   : > { %v1498_v60 = vadd.f32 %v700_v27, %v604_v59  ;;  %v607_v62 = vadd.f32 %v1103_v58, %v1442_v51 }
 0x121   : > { %v1501_v63 = vadd.f32 %v703_v31, %v607_v62  ;;  %v1104_v1 = vpop.f32.mrb[20].mxu0  ;;  %v742_v2 = vsel %vm733_vm0, %v1498_v60, -inf }
 0x122   : > { %v1105_v3 = vpop.f32.mrb[21].mxu0  ;;  %766 = vmax.xlane.f32.xlu0 %v742_v2 }
 0x123   : > { %v1106_v4 = vadd.f32 %v1105_v3, %v1104_v1  ;;  %v1107_v5 = vpop.f32.mrb[22].mxu0  ;;  %v743_v6 = vsel %vm733_vm0, %v1501_v63, -inf }
 0x124   : > { %v1108_v7 = vpop.f32.mrb[23].mxu0  ;;  %768 = vmax.xlane.f32.xlu1 %v743_v6 }
 0x125   : > { %v612_v8 = vadd.f32 %v1106_v4, %v1442_v51  ;;  %v1109_v9 = vadd.f32 %v1108_v7, %v1107_v5 }
 0x127   : > { %v615_v10 = vadd.f32 %v1109_v9, %v1442_v51  ;;  %v1511_v11 = vadd.f32 %v1164_v23, %v612_v8 }
 0x129   : > { %v1110_v12 = vpop.f32.mrb[24].mxu0  ;;  %v744_v13 = vsel %vm733_vm0, %v1511_v11, -inf  ;;  %v1516_v15 = vadd.f32 %v1165_v28, %v615_v10 }
 0x12a   : > { %v1111_v16 = vpop.f32.mrb[25].mxu0  ;;  %770 = vmax.xlane.f32.xlu0 %v744_v13 }
 0x12b   : > { %v1112_v17 = vadd.f32 %v1111_v16, %v1110_v12  ;;  %v1113_v19 = vpop.f32.mrb[26].mxu0  ;;  %v745_v20 = vsel %vm733_vm0, %v1516_v15, -inf }
 0x12c   : > { %v1114_v21 = vpop.f32.mrb[27].mxu0  ;;  %772 = vmax.xlane.f32.xlu1 %v745_v20 }
 0x12d   : > { %v1115_v22 = vadd.f32 %v1114_v21, %v1113_v19  ;;  %v620_v23 = vadd.f32 %v1112_v17, %v1442_v51 }
 0x12f   : > { %v1522_v24 = vadd.f32 %v716_v43, %v620_v23  ;;  %v623_v25 = vadd.f32 %v1115_v22, %v1442_v51 }
 0x131   : > { %v1525_v26 = vadd.f32 %v719_v47, %v623_v25  ;;  %v1116_v27 = vpop.f32.mrb[28].mxu0  ;;  %v746_v28 = vsel %vm733_vm0, %v1522_v24, -inf }
 0x132   : > { %v1117_v30 = vpop.f32.mrb[29].mxu0  ;;  %774 = vmax.xlane.f32.xlu0 %v746_v28 }
 0x133   : > { %v1118_v31 = vadd.f32 %v1117_v30, %v1116_v27  ;;  %v1119_v33 = vpop.f32.mrb[30].mxu0  ;;  %v747_v34 = vsel %vm733_vm0, %v1525_v26, -inf }
 0x134   : > { %v1120_v35 = vpop.f32.mrb[31].mxu0  ;;  %776 = vmax.xlane.f32.xlu1 %v747_v34 }
 0x135   : > { %v628_v36 = vadd.f32 %v1118_v31, %v1442_v51  ;;  %v1121_v37 = vadd.f32 %v1120_v35, %v1119_v33 }
 0x137   : > { %v631_v38 = vadd.f32 %v1121_v37, %v1442_v51  ;;  %v1536_v39 = vadd.f32 %v1483_v40, %v628_v36 }
 0x139   : > { %v748_v41 = vsel %vm733_vm0, %v1536_v39, -inf  ;;  %v1541_v42 = vadd.f32 %v1169_v44, %v631_v38 }
 0x13a   : > { %778 = vmax.xlane.f32.xlu0 %v748_v41 }
 0x13b   : > { %v749_v43 = vsel %vm733_vm0, %v1541_v42, -inf }
 0x13c   : > { %780 = vmax.xlane.f32.xlu1 %v749_v43 }
 0x18f   : > { %v751_v45 = vpop.xlane.xlu0 %750 }
 0x190   : > { %v1547_v47 = vsub.f32 %v1448_v61, %v751_v45 }
 0x192   : > { %v798_v51 = vmul.f32 1.442695, %v1547_v47 }
 0x193   : > { %v753_v40 = vpop.xlane.xlu0 %752 }
 0x194   : > { %1235 = vpow2.f32 %v798_v51  ;;  %v1551_v48 = vsub.f32 %v1451_v0, %v753_v40 }
 0x196   : > { %v800_v44 = vmul.f32 1.442695, %v1551_v48 }
 0x197   : > { %v755_v49 = vpop.xlane.xlu1 %754 }
 0x198   : > { %1237 = vpow2.f32 %v800_v44  ;;  %v1555_v53 = vsub.f32 %v1461_v14, %v755_v49 }
 0x19a   : > { %v802_v54 = vmul.f32 1.442695, %v1555_v53 }
 0x19b   : > { %v757_v55 = vpop.xlane.xlu1 %756 }
 0x19c   : > { %1239 = vpow2.f32 %v802_v54  ;;  %v1559_v61 = vsub.f32 %v1466_v18, %v757_v55 }
 0x19e   : > { %v1236_v56 = vpop.eup %1235  ;;  %v804_v57 = vmul.f32 1.442695, %v1559_v61 }
 0x19f   : > { %v759_v58 = vpop.xlane.xlu0 %758  ;;  %v830_v0 = vsel %vm733_vm0, %v1236_v56, 0.0 }
 0x1a0   : > { %1241 = vpow2.f32 %v804_v57  ;;  %v1565_v59 = vsub.f32 %v1472_v29, %v759_v58  ;;  %846 = vadd.xlane.f32.xlu0 %v830_v0 }
 0x1a1   : > { %v761_v14 = vpop.xlane.xlu1 %760 }
 0x1a2   : > { %v1238_v62 = vpop.eup %1237  ;;  %v806_v1 = vmul.f32 1.442695, %v1565_v59  ;;  %v1569_v2 = vsub.f32 %v1475_v32, %v761_v14 }
 0x1a3   : > { %v831_v18 = vsel %vm733_vm0, %v1238_v62, 0.0 }
 0x1a4   : > { %1243 = vpow2.f32 %v806_v1  ;;  %v808_v3 = vmul.f32 1.442695, %v1569_v2  ;;  %848 = vadd.xlane.f32.xlu1 %v831_v18 }
 0x1a6   : > { %v1240_v4 = vpop.eup %1239  ;;  %1245 = vpow2.f32 %v808_v3 }
 0x1a7   : > { %v763_v5 = vpop.xlane.xlu0 %762  ;;  %v832_v29 = vsel %vm733_vm0, %v1240_v4, 0.0 }
 0x1a8   : > { %v1577_v6 = vsub.f32 %v1487_v46, %v763_v5  ;;  %850 = vadd.xlane.f32.xlu0 %v832_v29 }
 0x1a9   : > { %v765_v7 = vpop.xlane.xlu1 %764 }
 0x1aa   : > { %v1242_v32 = vpop.eup %1241  ;;  %v810_v8 = vmul.f32 1.442695, %v1577_v6  ;;  %v1581_v9 = vsub.f32 %v1492_v50, %v765_v7 }
 0x1ab   : > { %v833_v10 = vsel %vm733_vm0, %v1242_v32, 0.0 }
 0x1ac   : > { %1247 = vpow2.f32 %v810_v8  ;;  %v812_v12 = vmul.f32 1.442695, %v1581_v9  ;;  %852 = vadd.xlane.f32.xlu1 %v833_v10 }
 0x1ae   : > { %v1244_v13 = vpop.eup %1243  ;;  %1249 = vpow2.f32 %v812_v12 }
 0x1af   : > { %v767_v16 = vpop.xlane.xlu0 %766  ;;  %v834_v46 = vsel %vm733_vm0, %v1244_v13, 0.0 }
 0x1b0   : > { %v1246_v17 = vpop.eup %1245  ;;  %v1589_v19 = vsub.f32 %v1498_v60, %v767_v16  ;;  %854 = vadd.xlane.f32.xlu0 %v834_v46 }
 0x1b1   : > { %v769_v50 = vpop.xlane.xlu1 %768  ;;  %v835_v20 = vsel %vm733_vm0, %v1246_v17, 0.0 }
 0x1b2   : > { %v814_v21 = vmul.f32 1.442695, %v1589_v19  ;;  %v1595_v22 = vsub.f32 %v1501_v63, %v769_v50  ;;  %856 = vadd.xlane.f32.xlu1 %v835_v20 }
 0x1b4   : > { %1251 = vpow2.f32 %v814_v21  ;;  %v816_v23 = vmul.f32 1.442695, %v1595_v22 }
 0x1b6   : > { %v1248_v25 = vpop.eup %1247  ;;  %1253 = vpow2.f32 %v816_v23 }
 0x1b7   : > { %v771_v27 = vpop.xlane.xlu0 %770  ;;  %v836_v60 = vsel %vm733_vm0, %v1248_v25, 0.0 }
 0x1b8   : > { %v1250_v28 = vpop.eup %1249  ;;  %v1601_v30 = vsub.f32 %v1511_v11, %v771_v27  ;;  %858 = vadd.xlane.f32.xlu0 %v836_v60 }
 0x1b9   : > { %v773_v31 = vpop.xlane.xlu1 %772  ;;  %v837_v63 = vsel %vm733_vm0, %v1250_v28, 0.0 }
 0x1ba   : > { %v818_v33 = vmul.f32 1.442695, %v1601_v30  ;;  %v1607_v34 = vsub.f32 %v1516_v15, %v773_v31  ;;  %860 = vadd.xlane.f32.xlu1 %v837_v63 }
 0x1bc   : > { %1255 = vpow2.f32 %v818_v33  ;;  %v820_v35 = vmul.f32 1.442695, %v1607_v34 }
 0x1be   : > { %v1252_v36 = vpop.eup %1251  ;;  %1257 = vpow2.f32 %v820_v35 }
 0x1bf   : > { %v775_v37 = vpop.xlane.xlu0 %774  ;;  %v838_v11 = vsel %vm733_vm0, %v1252_v36, 0.0 }
 0x1c0   : > { %v1254_v38 = vpop.eup %1253  ;;  %v1613_v41 = vsub.f32 %v1522_v24, %v775_v37  ;;  %862 = vadd.xlane.f32.xlu0 %v838_v11 }
 0x1c1   : > { %v777_v43 = vpop.xlane.xlu1 %776  ;;  %v839_v15 = vsel %vm733_vm0, %v1254_v38, 0.0 }
 0x1c2   : > { %v822_v45 = vmul.f32 1.442695, %v1613_v41  ;;  %v1619_v51 = vsub.f32 %v1525_v26, %v777_v43  ;;  %864 = vadd.xlane.f32.xlu1 %v839_v15 }
 0x1c4   : > { %1259 = vpow2.f32 %v822_v45  ;;  %v824_v40 = vmul.f32 1.442695, %v1619_v51 }
 0x1c6   : > { %v1256_v44 = vpop.eup %1255  ;;  %1261 = vpow2.f32 %v824_v40 }
 0x1c7   : > { %v779_v49 = vpop.xlane.xlu0 %778  ;;  %v840_v24 = vsel %vm733_vm0, %v1256_v44, 0.0 }
 0x1c8   : > { %v1258_v54 = vpop.eup %1257  ;;  %v1625_v55 = vsub.f32 %v1536_v39, %v779_v49  ;;  %866 = vadd.xlane.f32.xlu0 %v840_v24 }
 0x1c9   : > { %v781_v56 = vpop.xlane.xlu1 %780  ;;  %v841_v26 = vsel %vm733_vm0, %v1258_v54, 0.0 }
 0x1ca   : > { %v826_v57 = vmul.f32 1.442695, %v1625_v55  ;;  %v1631_v58 = vsub.f32 %v1541_v42, %v781_v56  ;;  %868 = vadd.xlane.f32.xlu1 %v841_v26 }
 0x1cc   : > { %1263 = vpow2.f32 %v826_v57  ;;  %v828_v0 = vmul.f32 1.442695, %v1631_v58 }
 0x1ce   : > { %v1260_v14 = vpop.eup %1259  ;;  %1265 = vpow2.f32 %v828_v0 }
 0x1cf   : > { %v842_v39 = vsel %vm733_vm0, %v1260_v14, 0.0 }
 0x1d0   : > { %v1262_v62 = vpop.eup %1261  ;;  %870 = vadd.xlane.f32.xlu0 %v842_v39 }
 0x1d1   : > { %v843_v1 = vsel %vm733_vm0, %v1262_v62, 0.0 }
 0x1d2   : > { %872 = vadd.xlane.f32.xlu1 %v843_v1 }
 0x1d6   : > { %v1264_v18 = vpop.eup %1263 }
 0x1d7   : > { %v844_v42 = vsel %vm733_vm0, %v1264_v18, 0.0 }
 0x1d8   : > { %v1266_v3 = vpop.eup %1265  ;;  %874 = vadd.xlane.f32.xlu0 %v844_v42 }
 0x1d9   : > { %v845_v4 = vsel %vm733_vm0, %v1266_v3, 0.0 }
 0x1da   : > { %876 = vadd.xlane.f32.xlu1 %v845_v4 }
 0x22d   : > { %v847_v5 = vpop.xlane.xlu0 %846 }
 0x22e   : > { %1267 = vlog2.f32 %v847_v5 }
 0x231   : > { %v849_v29 = vpop.xlane.xlu1 %848 }
 0x232   : > { %1269 = vlog2.f32 %v849_v29 }
 0x235   : > { %v851_v7 = vpop.xlane.xlu0 %850 }
 0x236   : > { %1271 = vlog2.f32 %v851_v7 }
 0x238   : > { %v1268_v32 = vpop.eup %1267 }
 0x239   : > { %v879_v8 = vmul.f32 0.6931472, %v1268_v32  ;;  %v853_v10 = vpop.xlane.xlu1 %852 }
 0x23a   : > { %1273 = vlog2.f32 %v853_v10 }
 0x23b   : > { %v910_v52 = vsub.f32 %v1547_v47, %v879_v8 }
 0x23c   : > { %v1270_v12 = vpop.eup %1269 }
 0x23d   : > { %926 = vst [vmem:[%s1646_s21] sm:$0xff] %v910_v52  ;;  %v881_v13 = vmul.f32 0.6931472, %v1270_v12  ;;  %v855_v16 = vpop.xlane.xlu0 %854 }
 0x23e   : > { %1275 = vlog2.f32 %v855_v16 }
 0x23f   : > { %v911_v46 = vsub.f32 %v1551_v48, %v881_v13  ;;  %v857_v17 = vpop.xlane.xlu1 %856 }
 0x240   : > { %v1272_v50 = vpop.eup %1271  ;;  %1277 = vlog2.f32 %v857_v17 }
 0x241   : > { %927 = vst [vmem:[%s1646_s21 + $0x8] sm:$0xff] %v911_v46  ;;  %v883_v20 = vmul.f32 0.6931472, %v1272_v50 }
 0x243   : > { %v912_v21 = vsub.f32 %v1555_v53, %v883_v20 }
 0x244   : > { %v1274_v23 = vpop.eup %1273 }
 0x245   : > { %928 = vst [vmem:[%s1646_s21 + $0x10] sm:$0xff] %v912_v21  ;;  %v885_v25 = vmul.f32 0.6931472, %v1274_v23  ;;  %v859_v47 = vpop.xlane.xlu0 %858 }
 0x246   : > { %1279 = vlog2.f32 %v859_v47 }
 0x247   : > { %v913_v27 = vsub.f32 %v1559_v61, %v885_v25  ;;  %v861_v60 = vpop.xlane.xlu1 %860 }
 0x248   : > { %v1276_v28 = vpop.eup %1275  ;;  %1281 = vlog2.f32 %v861_v60 }
 0x249   : > { %929 = vst [vmem:[%s1646_s21 + $0x18] sm:$0xff] %v913_v27  ;;  %v887_v48 = vmul.f32 0.6931472, %v1276_v28 }
 0x24a   : > { %v1278_v31 = vpop.eup %1277 }
 0x24b   : > { %v914_v63 = vsub.f32 %v1565_v59, %v887_v48  ;;  %v889_v33 = vmul.f32 0.6931472, %v1278_v31 }
 0x24d   : > { %930 = vst [vmem:[%s1646_s21 + $0x20] sm:$0xff] %v914_v63  ;;  %v915_v53 = vsub.f32 %v1569_v2, %v889_v33  ;;  %v863_v35 = vpop.xlane.xlu0 %862 }
 0x24e   : > { %1283 = vlog2.f32 %v863_v35 }
 0x24f   : > { %931 = vst [vmem:[%s1646_s21 + $0x28] sm:$0xff] %v915_v53  ;;  %v865_v36 = vpop.xlane.xlu1 %864 }
 0x250   : > { %v1280_v37 = vpop.eup %1279  ;;  %1285 = vlog2.f32 %v865_v36 }
 0x251   : > { %v891_v61 = vmul.f32 0.6931472, %v1280_v37 }
 0x252   : > { %v1282_v11 = vpop.eup %1281 }
 0x253   : > { %v916_v38 = vsub.f32 %v1577_v6, %v891_v61  ;;  %v893_v43 = vmul.f32 0.6931472, %v1282_v11 }
 0x255   : > { %932 = vst [vmem:[%s1646_s21 + $0x30] sm:$0xff] %v916_v38  ;;  %v917_v59 = vsub.f32 %v1581_v9, %v893_v43  ;;  %v867_v15 = vpop.xlane.xlu0 %866 }
 0x256   : > { %1287 = vlog2.f32 %v867_v15 }
 0x257   : > { %933 = vst [vmem:[%s1646_s21 + $0x38] sm:$0xff] %v917_v59  ;;  %v869_v2 = vpop.xlane.xlu1 %868 }
 0x258   : > { %v1284_v45 = vpop.eup %1283  ;;  %1289 = vlog2.f32 %v869_v2 }
 0x259   : > { %v895_v40 = vmul.f32 0.6931472, %v1284_v45 }
 0x25a   : > { %v1286_v44 = vpop.eup %1285 }
 0x25b   : > { %v918_v49 = vsub.f32 %v1589_v19, %v895_v40  ;;  %v897_v24 = vmul.f32 0.6931472, %v1286_v44 }
 0x25d   : > { %934 = vst [vmem:[%s1646_s21 + $0x40] sm:$0xff] %v918_v49  ;;  %v919_v6 = vsub.f32 %v1595_v22, %v897_v24  ;;  %v871_v54 = vpop.xlane.xlu0 %870 }
 0x25e   : > { %1291 = vlog2.f32 %v871_v54 }
 0x25f   : > { %935 = vst [vmem:[%s1646_s21 + $0x48] sm:$0xff] %v919_v6  ;;  %v873_v9 = vpop.xlane.xlu1 %872 }
 0x260   : > { %v1288_v56 = vpop.eup %1287  ;;  %1293 = vlog2.f32 %v873_v9 }
 0x261   : > { %v899_v26 = vmul.f32 0.6931472, %v1288_v56 }
 0x262   : > { %v1290_v57 = vpop.eup %1289 }
 0x263   : > { %v920_v0 = vsub.f32 %v1601_v30, %v899_v26  ;;  %v901_v14 = vmul.f32 0.6931472, %v1290_v57 }
 0x265   : > { %936 = vst [vmem:[%s1646_s21 + $0x50] sm:$0xff] %v920_v0  ;;  %v921_v19 = vsub.f32 %v1607_v34, %v901_v14  ;;  %v875_v39 = vpop.xlane.xlu0 %874 }
 0x266   : > { %1295 = vlog2.f32 %v875_v39 }
 0x267   : > { %937 = vst [vmem:[%s1646_s21 + $0x58] sm:$0xff] %v921_v19  ;;  %v877_v22 = vpop.xlane.xlu1 %876 }
 0x268   : > { %v1292_v62 = vpop.eup %1291  ;;  %1297 = vlog2.f32 %v877_v22 }
 0x269   : > { %v903_v1 = vmul.f32 0.6931472, %v1292_v62 }
 0x26a   : > { %v1294_v18 = vpop.eup %1293 }
 0x26b   : > { %v922_v42 = vsub.f32 %v1613_v41, %v903_v1  ;;  %v905_v3 = vmul.f32 0.6931472, %v1294_v18 }
 0x26d   : > { %938 = vst [vmem:[%s1646_s21 + $0x60] sm:$0xff] %v922_v42  ;;  %v923_v30 = vsub.f32 %v1619_v51, %v905_v3 }
 0x26f   : > { %939 = vst [vmem:[%s1646_s21 + $0x68] sm:$0xff] %v923_v30 }
 0x270   : > { %v1296_v4 = vpop.eup %1295 }
 0x271   : > { %v907_v5 = vmul.f32 0.6931472, %v1296_v4 }
 0x272   : > { %v1298_v34 = vpop.eup %1297 }
 0x273   : > { %v924_v29 = vsub.f32 %v1625_v55, %v907_v5  ;;  %v909_v7 = vmul.f32 0.6931472, %v1298_v34 }
 0x275   : > { %940 = vst [vmem:[%s1646_s21 + $0x70] sm:$0xff] %v924_v29  ;;  %v925_v32 = vsub.f32 %v1631_v58, %v909_v7 }
 0x277   : > { %941 = vst [vmem:[%s1646_s21 + $0x78] sm:$0xff] %v925_v32 }
 0x278 PF: > { %s13_s12 = sadd.s32 1, %s1305_s12  }
 0x279   : > { %p10_p4 = scmp.ge.s32.totalorder %s13_s12, 5  }
 0x27b   :  { %12 = sbr.rel (!%p10_p4) target bundleno = 1 (0x1), region = 62 }

</bundles_post_ra>
